<compile_context>
chip_gen: v5e
topology: v5e:2x2
jax: 0.10.0
libtpu: 0.0.40
codegen_flags: <defaults>
</compile_context>

<pallas_src>
import jax
import jax.numpy as jnp
from jax import lax
from jax.experimental import pallas as pl
from jax.experimental.pallas import tpu as pltpu

LANE = 128  # TPU lane width; hidden dim is zero-padded (per gate) to this.


def _charrnn_lstm_kernel(x_ref, whh_ref, wdec_ref, bdec_ref, out_ref,
                         h_sc, c_sc, hbuf):
    """One (n-block, t-block) grid step of the LSTM + fused decoder.

    x_ref   : (tt, tn, 4*Hp) f32   pre-projected inputs (bias folded in)
    whh_ref : (Hp, 4*Hp)     bf16  pre-transposed, per-gate padded W_hh
    wdec_ref: (Hp, V)        bf16  pre-transposed, padded decoder weight
    bdec_ref: (1, V)         f32   decoder bias
    out_ref : (tt, tn, V)    f32   logits for this block (time-major)
    h_sc/c_sc: (tn, Hp)      f32   recurrent state, persists across t-blocks
    hbuf    : (tt, tn, Hp)   f32   per-block hidden states for the decoder
    """
    tt, tn, _ = x_ref.shape
    Hp = h_sc.shape[-1]
    V = out_ref.shape[-1]

    # First time-block for this n-block: reset the recurrent state (h0=c0=0).
    @pl.when(pl.program_id(1) == 0)
    def _init():
        h_sc[...] = jnp.zeros_like(h_sc)
        c_sc[...] = jnp.zeros_like(c_sc)

    whh = whh_ref[...]                          # (Hp, 4*Hp) bf16, stays resident

    def step(lt, carry):
        # Input projection + both LSTM biases were pre-folded into x_ref, so the
        # only per-step MXU work is the recurrent matmul (bf16 in, f32 acc).
        x_t = x_ref[lt]                                           # (tn, 4*Hp) f32
        h = h_sc[...]
        c = c_sc[...]
        gates = x_t + jnp.dot(h.astype(jnp.bfloat16), whh,
                              preferred_element_type=jnp.float32)  # (tn, 4*Hp)
        # PyTorch gate order: i, f, g, o.  Hp == 128 -> lane-aligned slices.
        i_g = jax.nn.sigmoid(gates[:, 0 * Hp:1 * Hp])
        f_g = jax.nn.sigmoid(gates[:, 1 * Hp:2 * Hp])
        g_g = jnp.tanh(gates[:, 2 * Hp:3 * Hp])
        o_g = jax.nn.sigmoid(gates[:, 3 * Hp:4 * Hp])
        c_new = f_g * c + i_g * g_g
        h_new = o_g * jnp.tanh(c_new)
        h_sc[...] = h_new
        c_sc[...] = c_new
        hbuf[lt] = h_new
        return carry

    # Trip count == tt (time-block size): the T grid bounds code size, so this
    # full unroll is the bounded-unroll the recurrence needs for LLO visibility.
    lax.fori_loop(0, tt, step, 0, unroll=True)

    # Decoder hoisted out of the recurrence: a single (tt*tn, Hp) x (Hp, V)
    # matmul + one block store, instead of tt tiny matmuls / masked stores.
    h_flat = hbuf[...].reshape(tt * tn, Hp).astype(jnp.bfloat16)
    logits = (jnp.dot(h_flat, wdec_ref[...], preferred_element_type=jnp.float32)
              + bdec_ref[...])                                     # (tt*tn, V)
    out_ref[...] = logits.reshape(tt, tn, V).astype(out_ref.dtype)


def prepare_params(params, hidden_size):
    """Pre-transpose + per-gate zero-pad weights to Hp=128 lanes; fold biases.

    Padding is exact: padded gate columns get 0 pre-activations -> padded c/h
    stay 0, and padded decoder rows are 0, so results match the unpadded model.
    """
    H = hidden_size
    Hp = ((H + LANE - 1) // LANE) * LANE
    w_ih = params["w_ih"]                     # (4H, V) torch weight_ih_l0
    w_hh = params["w_hh"]                     # (4H, H) torch weight_hh_l0
    bias = params["b_ih"] + params["b_hh"]    # (4H,)
    w_dec = params["w_dec"]                   # (V, H)  decoder.weight
    b_dec = params["b_dec"]                   # (V,)    decoder.bias
    V = w_ih.shape[1]

    w_ih_t = jnp.zeros((V, 4 * Hp), jnp.float32)   # gathered per token (+bias)
    w_hh_t = jnp.zeros((Hp, 4 * Hp), jnp.float32)
    for g in range(4):                              # per-gate padding (i,f,g,o)
        w_ih_t = w_ih_t.at[:, g * Hp:g * Hp + H].set(
            w_ih[g * H:(g + 1) * H, :].T + bias[g * H:(g + 1) * H][None, :])
        w_hh_t = w_hh_t.at[:H, g * Hp:g * Hp + H].set(
            w_hh[g * H:(g + 1) * H, :].T)
    w_dec_t = jnp.zeros((Hp, V), jnp.float32).at[:H, :].set(w_dec.T)

    return {
        "w_ih_t": w_ih_t,                              # f32 (only gathered/added)
        "w_hh_t": w_hh_t.astype(jnp.bfloat16),         # bf16 MXU operand
        "w_dec_t": w_dec_t.astype(jnp.bfloat16),       # bf16 MXU operand
        "b_dec": b_dec.reshape(1, V).astype(jnp.float32),
    }, Hp


def charrnn_forward(tokens, params, vocab_size, hidden_size, *, tn=8, tt=8):
    """tokens: int32 (seq_len, batch_size). Returns (batch_size*seq_len, vocab)."""
    S, B = tokens.shape
    N, T, V = S, B, vocab_size          # N = LSTM batch (parallel), T = time
    tn = min(tn, N)
    tt = min(tt, T)
    assert N % tn == 0 and T % tt == 0, "seq_len/batch_size must tile by (tn, tt)"

    prepped, Hp = prepare_params(params, hidden_size)

    # One-hot @ W_ih^T == embedding gather of the pre-transposed rows (+ bias).
    tokens_tm = tokens.T                                          # (T, N)
    x_proj = jnp.take(prepped["w_ih_t"], tokens_tm, axis=0)       # (T, N, 4*Hp)

    logits_tm = pl.pallas_call(
        _charrnn_lstm_kernel,
        out_shape=jax.ShapeDtypeStruct((T, N, V), jnp.float32),
        grid_spec=pltpu.PrefetchScalarGridSpec(
            num_scalar_prefetch=0,
            grid=(N // tn, T // tt),                 # (parallel, arbitrary)
            in_specs=[
                pl.BlockSpec((tt, tn, 4 * Hp), lambda n, t: (t, n, 0)),
                pl.BlockSpec((Hp, 4 * Hp), lambda n, t: (0, 0)),
                pl.BlockSpec((Hp, V), lambda n, t: (0, 0)),
                pl.BlockSpec((1, V), lambda n, t: (0, 0)),
            ],
            out_specs=pl.BlockSpec((tt, tn, V), lambda n, t: (t, n, 0)),
            scratch_shapes=[
                pltpu.VMEM((tn, Hp), jnp.float32),       # h state
                pltpu.VMEM((tn, Hp), jnp.float32),       # c state
                pltpu.VMEM((tt, tn, Hp), jnp.float32),   # h history for decoder
            ],
        ),
        compiler_params=pltpu.CompilerParams(
            dimension_semantics=("parallel", "arbitrary"),
            vmem_limit_bytes=32 * 1024 * 1024,
        ),
    )(x_proj, prepped["w_hh_t"], prepped["w_dec_t"], prepped["b_dec"])

    # torch order: (S, B, V).view(B*S, V).  The (T,N,V)->(N,T,V) reorder of the
    # small logits tensor is left to a fused XLA transpose+reshape (an in-kernel
    # sublane transpose of the block was deliberately avoided for robustness).
    return jnp.transpose(logits_tm, (1, 0, 2)).reshape(N * T, V)


def _reference_forward(tokens, params, vocab_size, hidden_size):
    """Pure-JAX f32 reference (lax.scan LSTM) for correctness checking."""
    S, B = tokens.shape
    onehot = jax.nn.one_hot(tokens, vocab_size, dtype=jnp.float32)   # (S, B, V)
    x_tm = jnp.transpose(onehot, (1, 0, 2))                          # (T, N, V)
    H = hidden_size
    wih_t = params["w_ih"].T
    whh_t = params["w_hh"].T
    bias = (params["b_ih"] + params["b_hh"])[None, :]

    def step(carry, x_t):
        h, c = carry
        g = x_t @ wih_t + h @ whh_t + bias
        i = jax.nn.sigmoid(g[:, 0 * H:1 * H])
        f = jax.nn.sigmoid(g[:, 1 * H:2 * H])
        gg = jnp.tanh(g[:, 2 * H:3 * H])
        o = jax.nn.sigmoid(g[:, 3 * H:4 * H])
        c = f * c + i * gg
        h = o * jnp.tanh(c)
        return (h, c), h

    N = x_tm.shape[1]
    h0 = jnp.zeros((N, H), jnp.float32)
    (_, _), hs = lax.scan(step, (h0, h0), x_tm)                      # (T, N, H)
    logits_tm = hs @ params["w_dec"].T + params["b_dec"][None, :]    # (T, N, V)
    return jnp.transpose(logits_tm, (1, 0, 2)).reshape(B * S, vocab_size)


def init_params(key, vocab_size, hidden_size):
    H, V = hidden_size, vocab_size
    k = 1.0 / jnp.sqrt(jnp.float32(H))
    ks = jax.random.split(key, 6)
    return {
        "w_ih": jax.random.uniform(ks[0], (4 * H, V), jnp.float32, -k, k),
        "w_hh": jax.random.uniform(ks[1], (4 * H, H), jnp.float32, -k, k),
        "b_ih": jax.random.uniform(ks[2], (4 * H,), jnp.float32, -k, k),
        "b_hh": jax.random.uniform(ks[3], (4 * H,), jnp.float32, -k, k),
        "w_dec": jax.random.uniform(ks[4], (V, H), jnp.float32, -k, k),
        "b_dec": jax.random.uniform(ks[5], (V,), jnp.float32, -k, k),
    }


if __name__ == "__main__":
    vocab_size = 32
    hidden_size = 32
    seq_len = 16      # dim0 of x in forward() -> LSTM batch (parallel) axis
    batch_size = 16   # dim1 of x in forward() -> time (recurrent) axis

    key = jax.random.PRNGKey(0)
    k_tok, k_par = jax.random.split(key)
    tokens = jax.random.randint(k_tok, (seq_len, batch_size), 0, vocab_size,
                                dtype=jnp.int32)
    params = init_params(k_par, vocab_size, hidden_size)

    fwd = jax.jit(lambda tok, prm: charrnn_forward(tok, prm, vocab_size,
                                                   hidden_size))
    out = jax.block_until_ready(fwd(tokens, params))

    ref = _reference_forward(tokens, params, vocab_size, hidden_size)
    assert out.shape == (batch_size * seq_len, vocab_size), out.shape
    # bf16 MXU operands (f32 accumulation) -> loosened tolerance vs f32 reference
    max_err = float(jnp.max(jnp.abs(out - ref)))
    assert jnp.allclose(out, ref, atol=5e-2, rtol=5e-2), max_err

    print("KERNEL_OK")
</pallas_src>

<mosaic_0001>
module attributes {stable_mosaic.version = 11 : i64} {
  func.func @_charrnn_lstm_kernel(%arg0: i32, %arg1: i32, %arg2: memref<8x8x512xf32, #tpu.memory_space<vmem>>, %arg3: memref<128x512xbf16, #tpu.memory_space<vmem>>, %arg4: memref<128x32xbf16, #tpu.memory_space<vmem>>, %arg5: memref<1x32xf32, #tpu.memory_space<vmem>>, %arg6: memref<8x8x32xf32, #tpu.memory_space<vmem>>, %arg7: memref<8x128xf32, #tpu.memory_space<vmem>>, %arg8: memref<8x128xf32, #tpu.memory_space<vmem>>, %arg9: memref<8x8x128xf32, #tpu.memory_space<vmem>>) attributes {dimension_semantics = [#tpu.dimension_semantics<parallel>, #tpu.dimension_semantics<arbitrary>], iteration_bounds = array<i64: 2, 2>, scalar_prefetch = 0 : i64, scratch_operands = 3 : i64, tpu.core_type = #tpu.core_type<tc>, window_params = [{transform_indices = @transform_0, window_bounds = array<i64: 8, 8, 512>}, {pipeline_mode = #tpu.pipeline_mode<synchronous>, transform_indices = @transform_1, window_bounds = array<i64: 128, 512>}, {pipeline_mode = #tpu.pipeline_mode<synchronous>, transform_indices = @transform_2, window_bounds = array<i64: 128, 32>}, {pipeline_mode = #tpu.pipeline_mode<synchronous>, transform_indices = @transform_3, window_bounds = array<i64: 1, 32>}, {transform_indices = @transform_4, window_bounds = array<i64: 8, 8, 32>}]} {
    %c0_i32 = arith.constant 0 : i32
    %0 = arith.cmpi eq, %arg1, %c0_i32 : i32
    %1 = arith.extui %0 : i1 to i32
    %c0_i32_0 = arith.constant 0 : i32
    %2 = arith.cmpi ne, %1, %c0_i32_0 : i32
    scf.if %2 {
      %cst_141 = arith.constant 0.000000e+00 : f32
      %326 = vector.broadcast %cst_141 : f32 to vector<8x128xf32>
      %c0_142 = arith.constant 0 : index
      %c0_143 = arith.constant 0 : index
      %327 = vector.load %arg7[%c0_142, %c0_143] : memref<8x128xf32, #tpu.memory_space<vmem>>, vector<8x128xf32>
      tpu.vector_store %arg7[%c0_142, %c0_143], %326 {strides = array<i32>} : memref<8x128xf32, #tpu.memory_space<vmem>>, vector<8x128xf32>,
      %cst_144 = arith.constant 0.000000e+00 : f32
      %328 = vector.broadcast %cst_144 : f32 to vector<8x128xf32>
      %c0_145 = arith.constant 0 : index
      %c0_146 = arith.constant 0 : index
      %329 = vector.load %arg8[%c0_145, %c0_146] : memref<8x128xf32, #tpu.memory_space<vmem>>, vector<8x128xf32>
      tpu.vector_store %arg8[%c0_145, %c0_146], %328 {strides = array<i32>} : memref<8x128xf32, #tpu.memory_space<vmem>>, vector<8x128xf32>,
    } else {
    }
    %c0 = arith.constant 0 : index
    %c0_1 = arith.constant 0 : index
    %3 = vector.load %arg3[%c0, %c0_1] : memref<128x512xbf16, #tpu.memory_space<vmem>>, vector<128x512xbf16>
    %c0_i32_2 = arith.constant 0 : i32
    %4 = arith.index_cast %c0_i32_2 : i32 to index
    %c0_3 = arith.constant 0 : index
    %c0_4 = arith.constant 0 : index
    %5 = vector.load %arg2[%4, %c0_3, %c0_4] : memref<8x8x512xf32, #tpu.memory_space<vmem>>, vector<1x8x512xf32>
    %6 = vector.shape_cast %5 : vector<1x8x512xf32> to vector<8x512xf32>
    %c0_5 = arith.constant 0 : index
    %c0_6 = arith.constant 0 : index
    %7 = vector.load %arg7[%c0_5, %c0_6] : memref<8x128xf32, #tpu.memory_space<vmem>>, vector<8x128xf32>
    %c0_7 = arith.constant 0 : index
    %c0_8 = arith.constant 0 : index
    %8 = vector.load %arg8[%c0_7, %c0_8] : memref<8x128xf32, #tpu.memory_space<vmem>>, vector<8x128xf32>
    %9 = arith.truncf %7 : vector<8x128xf32> to vector<8x128xbf16>
    %cst = arith.constant dense<0.000000e+00> : vector<8x512xf32>
    %10 = tpu.matmul %9, %3, %cst {dimension_numbers = #tpu.dot_dimension_numbers<[1], [0], [0], [1], [0, 0, 1, 1], [], []>} : vector<8x128xbf16>, vector<128x512xbf16>, vector<8x512xf32> -> vector<8x512xf32>
    %11 = arith.addf %6, %10 : vector<8x512xf32>
    %12 = vector.extract_strided_slice %11 {offsets = [0, 0], sizes = [8, 128], strides = [1, 1]} : vector<8x512xf32> to vector<8x128xf32>
    %13 = arith.negf %12 : vector<8x128xf32>
    %14 = math.exp %13 : vector<8x128xf32>
    %cst_9 = arith.constant 1.000000e+00 : f32
    %15 = vector.broadcast %cst_9 : f32 to vector<8x128xf32>
    %16 = arith.addf %15, %14 : vector<8x128xf32>
    %17 = arith.divf %15, %16 : vector<8x128xf32>
    %18 = vector.extract_strided_slice %11 {offsets = [0, 128], sizes = [8, 128], strides = [1, 1]} : vector<8x512xf32> to vector<8x128xf32>
    %19 = arith.negf %18 : vector<8x128xf32>
    %20 = math.exp %19 : vector<8x128xf32>
    %cst_10 = arith.constant 1.000000e+00 : f32
    %21 = vector.broadcast %cst_10 : f32 to vector<8x128xf32>
    %22 = arith.addf %21, %20 : vector<8x128xf32>
    %23 = arith.divf %21, %22 : vector<8x128xf32>
    %24 = vector.extract_strided_slice %11 {offsets = [0, 256], sizes = [8, 128], strides = [1, 1]} : vector<8x512xf32> to vector<8x128xf32>
    %25 = math.tanh %24 : vector<8x128xf32>
    %26 = vector.extract_strided_slice %11 {offsets = [0, 384], sizes = [8, 128], strides = [1, 1]} : vector<8x512xf32> to vector<8x128xf32>
    %27 = arith.negf %26 : vector<8x128xf32>
    %28 = math.exp %27 : vector<8x128xf32>
    %cst_11 = arith.constant 1.000000e+00 : f32
    %29 = vector.broadcast %cst_11 : f32 to vector<8x128xf32>
    %30 = arith.addf %29, %28 : vector<8x128xf32>
    %31 = arith.divf %29, %30 : vector<8x128xf32>
    %32 = arith.mulf %23, %8 : vector<8x128xf32>
    %33 = arith.mulf %17, %25 : vector<8x128xf32>
    %34 = arith.addf %32, %33 : vector<8x128xf32>
    %35 = math.tanh %34 : vector<8x128xf32>
    %36 = arith.mulf %31, %35 : vector<8x128xf32>
    %c0_12 = arith.constant 0 : index
    %c0_13 = arith.constant 0 : index
    %37 = vector.load %arg7[%c0_12, %c0_13] : memref<8x128xf32, #tpu.memory_space<vmem>>, vector<8x128xf32>
    tpu.vector_store %arg7[%c0_12, %c0_13], %36 {strides = array<i32>} : memref<8x128xf32, #tpu.memory_space<vmem>>, vector<8x128xf32>,
    %c0_14 = arith.constant 0 : index
    %c0_15 = arith.constant 0 : index
    %38 = vector.load %arg8[%c0_14, %c0_15] : memref<8x128xf32, #tpu.memory_space<vmem>>, vector<8x128xf32>
    tpu.vector_store %arg8[%c0_14, %c0_15], %34 {strides = array<i32>} : memref<8x128xf32, #tpu.memory_space<vmem>>, vector<8x128xf32>,
    %39 = arith.index_cast %c0_i32_2 : i32 to index
    %c0_16 = arith.constant 0 : index
    %c0_17 = arith.constant 0 : index
    %40 = vector.load %arg9[%39, %c0_16, %c0_17] : memref<8x8x128xf32, #tpu.memory_space<vmem>>, vector<1x8x128xf32>
    %41 = vector.shape_cast %40 : vector<1x8x128xf32> to vector<8x128xf32>
    %42 = vector.shape_cast %36 : vector<8x128xf32> to vector<1x8x128xf32>
    tpu.vector_store %arg9[%39, %c0_16, %c0_17], %42 {strides = array<i32>} : memref<8x8x128xf32, #tpu.memory_space<vmem>>, vector<1x8x128xf32>,
    %c1_i32 = arith.constant 1 : i32
    %43 = arith.index_cast %c1_i32 : i32 to index
    %c0_18 = arith.constant 0 : index
    %c0_19 = arith.constant 0 : index
    %44 = vector.load %arg2[%43, %c0_18, %c0_19] : memref<8x8x512xf32, #tpu.memory_space<vmem>>, vector<1x8x512xf32>
    %45 = vector.shape_cast %44 : vector<1x8x512xf32> to vector<8x512xf32>
    %c0_20 = arith.constant 0 : index
    %c0_21 = arith.constant 0 : index
    %46 = vector.load %arg7[%c0_20, %c0_21] : memref<8x128xf32, #tpu.memory_space<vmem>>, vector<8x128xf32>
    %c0_22 = arith.constant 0 : index
    %c0_23 = arith.constant 0 : index
    %47 = vector.load %arg8[%c0_22, %c0_23] : memref<8x128xf32, #tpu.memory_space<vmem>>, vector<8x128xf32>
    %48 = arith.truncf %46 : vector<8x128xf32> to vector<8x128xbf16>
    %cst_24 = arith.constant dense<0.000000e+00> : vector<8x512xf32>
    %49 = tpu.matmul %48, %3, %cst_24 {dimension_numbers = #tpu.dot_dimension_numbers<[1], [0], [0], [1], [0, 0, 1, 1], [], []>} : vector<8x128xbf16>, vector<128x512xbf16>, vector<8x512xf32> -> vector<8x512xf32>
    %50 = arith.addf %45, %49 : vector<8x512xf32>
    %51 = vector.extract_strided_slice %50 {offsets = [0, 0], sizes = [8, 128], strides = [1, 1]} : vector<8x512xf32> to vector<8x128xf32>
    %52 = arith.negf %51 : vector<8x128xf32>
    %53 = math.exp %52 : vector<8x128xf32>
    %cst_25 = arith.constant 1.000000e+00 : f32
    %54 = vector.broadcast %cst_25 : f32 to vector<8x128xf32>
    %55 = arith.addf %54, %53 : vector<8x128xf32>
    %56 = arith.divf %54, %55 : vector<8x128xf32>
    %57 = vector.extract_strided_slice %50 {offsets = [0, 128], sizes = [8, 128], strides = [1, 1]} : vector<8x512xf32> to vector<8x128xf32>
    %58 = arith.negf %57 : vector<8x128xf32>
    %59 = math.exp %58 : vector<8x128xf32>
    %cst_26 = arith.constant 1.000000e+00 : f32
    %60 = vector.broadcast %cst_26 : f32 to vector<8x128xf32>
    %61 = arith.addf %60, %59 : vector<8x128xf32>
    %62 = arith.divf %60, %61 : vector<8x128xf32>
    %63 = vector.extract_strided_slice %50 {offsets = [0, 256], sizes = [8, 128], strides = [1, 1]} : vector<8x512xf32> to vector<8x128xf32>
    %64 = math.tanh %63 : vector<8x128xf32>
    %65 = vector.extract_strided_slice %50 {offsets = [0, 384], sizes = [8, 128], strides = [1, 1]} : vector<8x512xf32> to vector<8x128xf32>
    %66 = arith.negf %65 : vector<8x128xf32>
    %67 = math.exp %66 : vector<8x128xf32>
    %cst_27 = arith.constant 1.000000e+00 : f32
    %68 = vector.broadcast %cst_27 : f32 to vector<8x128xf32>
    %69 = arith.addf %68, %67 : vector<8x128xf32>
    %70 = arith.divf %68, %69 : vector<8x128xf32>
    %71 = arith.mulf %62, %47 : vector<8x128xf32>
    %72 = arith.mulf %56, %64 : vector<8x128xf32>
    %73 = arith.addf %71, %72 : vector<8x128xf32>
    %74 = math.tanh %73 : vector<8x128xf32>
    %75 = arith.mulf %70, %74 : vector<8x128xf32>
    %c0_28 = arith.constant 0 : index
    %c0_29 = arith.constant 0 : index
    %76 = vector.load %arg7[%c0_28, %c0_29] : memref<8x128xf32, #tpu.memory_space<vmem>>, vector<8x128xf32>
    tpu.vector_store %arg7[%c0_28, %c0_29], %75 {strides = array<i32>} : memref<8x128xf32, #tpu.memory_space<vmem>>, vector<8x128xf32>,
    %c0_30 = arith.constant 0 : index
    %c0_31 = arith.constant 0 : index
    %77 = vector.load %arg8[%c0_30, %c0_31] : memref<8x128xf32, #tpu.memory_space<vmem>>, vector<8x128xf32>
    tpu.vector_store %arg8[%c0_30, %c0_31], %73 {strides = array<i32>} : memref<8x128xf32, #tpu.memory_space<vmem>>, vector<8x128xf32>,
    %78 = arith.index_cast %c1_i32 : i32 to index
    %c0_32 = arith.constant 0 : index
    %c0_33 = arith.constant 0 : index
    %79 = vector.load %arg9[%78, %c0_32, %c0_33] : memref<8x8x128xf32, #tpu.memory_space<vmem>>, vector<1x8x128xf32>
    %80 = vector.shape_cast %79 : vector<1x8x128xf32> to vector<8x128xf32>
    %81 = vector.shape_cast %75 : vector<8x128xf32> to vector<1x8x128xf32>
    tpu.vector_store %arg9[%78, %c0_32, %c0_33], %81 {strides = array<i32>} : memref<8x8x128xf32, #tpu.memory_space<vmem>>, vector<1x8x128xf32>,
    %c2_i32 = arith.constant 2 : i32
    %82 = arith.index_cast %c2_i32 : i32 to index
    %c0_34 = arith.constant 0 : index
    %c0_35 = arith.constant 0 : index
    %83 = vector.load %arg2[%82, %c0_34, %c0_35] : memref<8x8x512xf32, #tpu.memory_space<vmem>>, vector<1x8x512xf32>
    %84 = vector.shape_cast %83 : vector<1x8x512xf32> to vector<8x512xf32>
    %c0_36 = arith.constant 0 : index
    %c0_37 = arith.constant 0 : index
    %85 = vector.load %arg7[%c0_36, %c0_37] : memref<8x128xf32, #tpu.memory_space<vmem>>, vector<8x128xf32>
    %c0_38 = arith.constant 0 : index
    %c0_39 = arith.constant 0 : index
    %86 = vector.load %arg8[%c0_38, %c0_39] : memref<8x128xf32, #tpu.memory_space<vmem>>, vector<8x128xf32>
    %87 = arith.truncf %85 : vector<8x128xf32> to vector<8x128xbf16>
    %cst_40 = arith.constant dense<0.000000e+00> : vector<8x512xf32>
    %88 = tpu.matmul %87, %3, %cst_40 {dimension_numbers = #tpu.dot_dimension_numbers<[1], [0], [0], [1], [0, 0, 1, 1], [], []>} : vector<8x128xbf16>, vector<128x512xbf16>, vector<8x512xf32> -> vector<8x512xf32>
    %89 = arith.addf %84, %88 : vector<8x512xf32>
    %90 = vector.extract_strided_slice %89 {offsets = [0, 0], sizes = [8, 128], strides = [1, 1]} : vector<8x512xf32> to vector<8x128xf32>
    %91 = arith.negf %90 : vector<8x128xf32>
    %92 = math.exp %91 : vector<8x128xf32>
    %cst_41 = arith.constant 1.000000e+00 : f32
    %93 = vector.broadcast %cst_41 : f32 to vector<8x128xf32>
    %94 = arith.addf %93, %92 : vector<8x128xf32>
    %95 = arith.divf %93, %94 : vector<8x128xf32>
    %96 = vector.extract_strided_slice %89 {offsets = [0, 128], sizes = [8, 128], strides = [1, 1]} : vector<8x512xf32> to vector<8x128xf32>
    %97 = arith.negf %96 : vector<8x128xf32>
    %98 = math.exp %97 : vector<8x128xf32>
    %cst_42 = arith.constant 1.000000e+00 : f32
    %99 = vector.broadcast %cst_42 : f32 to vector<8x128xf32>
    %100 = arith.addf %99, %98 : vector<8x128xf32>
    %101 = arith.divf %99, %100 : vector<8x128xf32>
    %102 = vector.extract_strided_slice %89 {offsets = [0, 256], sizes = [8, 128], strides = [1, 1]} : vector<8x512xf32> to vector<8x128xf32>
    %103 = math.tanh %102 : vector<8x128xf32>
    %104 = vector.extract_strided_slice %89 {offsets = [0, 384], sizes = [8, 128], strides = [1, 1]} : vector<8x512xf32> to vector<8x128xf32>
    %105 = arith.negf %104 : vector<8x128xf32>
    %106 = math.exp %105 : vector<8x128xf32>
    %cst_43 = arith.constant 1.000000e+00 : f32
    %107 = vector.broadcast %cst_43 : f32 to vector<8x128xf32>
    %108 = arith.addf %107, %106 : vector<8x128xf32>
    %109 = arith.divf %107, %108 : vector<8x128xf32>
    %110 = arith.mulf %101, %86 : vector<8x128xf32>
    %111 = arith.mulf %95, %103 : vector<8x128xf32>
    %112 = arith.addf %110, %111 : vector<8x128xf32>
    %113 = math.tanh %112 : vector<8x128xf32>
    %114 = arith.mulf %109, %113 : vector<8x128xf32>
    %c0_44 = arith.constant 0 : index
    %c0_45 = arith.constant 0 : index
    %115 = vector.load %arg7[%c0_44, %c0_45] : memref<8x128xf32, #tpu.memory_space<vmem>>, vector<8x128xf32>
    tpu.vector_store %arg7[%c0_44, %c0_45], %114 {strides = array<i32>} : memref<8x128xf32, #tpu.memory_space<vmem>>, vector<8x128xf32>,
    %c0_46 = arith.constant 0 : index
    %c0_47 = arith.constant 0 : index
    %116 = vector.load %arg8[%c0_46, %c0_47] : memref<8x128xf32, #tpu.memory_space<vmem>>, vector<8x128xf32>
    tpu.vector_store %arg8[%c0_46, %c0_47], %112 {strides = array<i32>} : memref<8x128xf32, #tpu.memory_space<vmem>>, vector<8x128xf32>,
    %117 = arith.index_cast %c2_i32 : i32 to index
    %c0_48 = arith.constant 0 : index
    %c0_49 = arith.constant 0 : index
    %118 = vector.load %arg9[%117, %c0_48, %c0_49] : memref<8x8x128xf32, #tpu.memory_space<vmem>>, vector<1x8x128xf32>
    %119 = vector.shape_cast %118 : vector<1x8x128xf32> to vector<8x128xf32>
    %120 = vector.shape_cast %114 : vector<8x128xf32> to vector<1x8x128xf32>
    tpu.vector_store %arg9[%117, %c0_48, %c0_49], %120 {strides = array<i32>} : memref<8x8x128xf32, #tpu.memory_space<vmem>>, vector<1x8x128xf32>,
    %c3_i32 = arith.constant 3 : i32
    %121 = arith.index_cast %c3_i32 : i32 to index
    %c0_50 = arith.constant 0 : index
    %c0_51 = arith.constant 0 : index
    %122 = vector.load %arg2[%121, %c0_50, %c0_51] : memref<8x8x512xf32, #tpu.memory_space<vmem>>, vector<1x8x512xf32>
    %123 = vector.shape_cast %122 : vector<1x8x512xf32> to vector<8x512xf32>
    %c0_52 = arith.constant 0 : index
    %c0_53 = arith.constant 0 : index
    %124 = vector.load %arg7[%c0_52, %c0_53] : memref<8x128xf32, #tpu.memory_space<vmem>>, vector<8x128xf32>
    %c0_54 = arith.constant 0 : index
    %c0_55 = arith.constant 0 : index
    %125 = vector.load %arg8[%c0_54, %c0_55] : memref<8x128xf32, #tpu.memory_space<vmem>>, vector<8x128xf32>
    %126 = arith.truncf %124 : vector<8x128xf32> to vector<8x128xbf16>
    %cst_56 = arith.constant dense<0.000000e+00> : vector<8x512xf32>
    %127 = tpu.matmul %126, %3, %cst_56 {dimension_numbers = #tpu.dot_dimension_numbers<[1], [0], [0], [1], [0, 0, 1, 1], [], []>} : vector<8x128xbf16>, vector<128x512xbf16>, vector<8x512xf32> -> vector<8x512xf32>
    %128 = arith.addf %123, %127 : vector<8x512xf32>
    %129 = vector.extract_strided_slice %128 {offsets = [0, 0], sizes = [8, 128], strides = [1, 1]} : vector<8x512xf32> to vector<8x128xf32>
    %130 = arith.negf %129 : vector<8x128xf32>
    %131 = math.exp %130 : vector<8x128xf32>
    %cst_57 = arith.constant 1.000000e+00 : f32
    %132 = vector.broadcast %cst_57 : f32 to vector<8x128xf32>
    %133 = arith.addf %132, %131 : vector<8x128xf32>
    %134 = arith.divf %132, %133 : vector<8x128xf32>
    %135 = vector.extract_strided_slice %128 {offsets = [0, 128], sizes = [8, 128], strides = [1, 1]} : vector<8x512xf32> to vector<8x128xf32>
    %136 = arith.negf %135 : vector<8x128xf32>
    %137 = math.exp %136 : vector<8x128xf32>
    %cst_58 = arith.constant 1.000000e+00 : f32
    %138 = vector.broadcast %cst_58 : f32 to vector<8x128xf32>
    %139 = arith.addf %138, %137 : vector<8x128xf32>
    %140 = arith.divf %138, %139 : vector<8x128xf32>
    %141 = vector.extract_strided_slice %128 {offsets = [0, 256], sizes = [8, 128], strides = [1, 1]} : vector<8x512xf32> to vector<8x128xf32>
    %142 = math.tanh %141 : vector<8x128xf32>
    %143 = vector.extract_strided_slice %128 {offsets = [0, 384], sizes = [8, 128], strides = [1, 1]} : vector<8x512xf32> to vector<8x128xf32>
    %144 = arith.negf %143 : vector<8x128xf32>
    %145 = math.exp %144 : vector<8x128xf32>
    %cst_59 = arith.constant 1.000000e+00 : f32
    %146 = vector.broadcast %cst_59 : f32 to vector<8x128xf32>
    %147 = arith.addf %146, %145 : vector<8x128xf32>
    %148 = arith.divf %146, %147 : vector<8x128xf32>
    %149 = arith.mulf %140, %125 : vector<8x128xf32>
    %150 = arith.mulf %134, %142 : vector<8x128xf32>
    %151 = arith.addf %149, %150 : vector<8x128xf32>
    %152 = math.tanh %151 : vector<8x128xf32>
    %153 = arith.mulf %148, %152 : vector<8x128xf32>
    %c0_60 = arith.constant 0 : index
    %c0_61 = arith.constant 0 : index
    %154 = vector.load %arg7[%c0_60, %c0_61] : memref<8x128xf32, #tpu.memory_space<vmem>>, vector<8x128xf32>
    tpu.vector_store %arg7[%c0_60, %c0_61], %153 {strides = array<i32>} : memref<8x128xf32, #tpu.memory_space<vmem>>, vector<8x128xf32>,
    %c0_62 = arith.constant 0 : index
    %c0_63 = arith.constant 0 : index
    %155 = vector.load %arg8[%c0_62, %c0_63] : memref<8x128xf32, #tpu.memory_space<vmem>>, vector<8x128xf32>
    tpu.vector_store %arg8[%c0_62, %c0_63], %151 {strides = array<i32>} : memref<8x128xf32, #tpu.memory_space<vmem>>, vector<8x128xf32>,
    %156 = arith.index_cast %c3_i32 : i32 to index
    %c0_64 = arith.constant 0 : index
    %c0_65 = arith.constant 0 : index
    %157 = vector.load %arg9[%156, %c0_64, %c0_65] : memref<8x8x128xf32, #tpu.memory_space<vmem>>, vector<1x8x128xf32>
    %158 = vector.shape_cast %157 : vector<1x8x128xf32> to vector<8x128xf32>
    %159 = vector.shape_cast %153 : vector<8x128xf32> to vector<1x8x128xf32>
    tpu.vector_store %arg9[%156, %c0_64, %c0_65], %159 {strides = array<i32>} : memref<8x8x128xf32, #tpu.memory_space<vmem>>, vector<1x8x128xf32>,
    %c4_i32 = arith.constant 4 : i32
    %160 = arith.index_cast %c4_i32 : i32 to index
    %c0_66 = arith.constant 0 : index
    %c0_67 = arith.constant 0 : index
    %161 = vector.load %arg2[%160, %c0_66, %c0_67] : memref<8x8x512xf32, #tpu.memory_space<vmem>>, vector<1x8x512xf32>
    %162 = vector.shape_cast %161 : vector<1x8x512xf32> to vector<8x512xf32>
    %c0_68 = arith.constant 0 : index
    %c0_69 = arith.constant 0 : index
    %163 = vector.load %arg7[%c0_68, %c0_69] : memref<8x128xf32, #tpu.memory_space<vmem>>, vector<8x128xf32>
    %c0_70 = arith.constant 0 : index
    %c0_71 = arith.constant 0 : index
    %164 = vector.load %arg8[%c0_70, %c0_71] : memref<8x128xf32, #tpu.memory_space<vmem>>, vector<8x128xf32>
    %165 = arith.truncf %163 : vector<8x128xf32> to vector<8x128xbf16>
    %cst_72 = arith.constant dense<0.000000e+00> : vector<8x512xf32>
    %166 = tpu.matmul %165, %3, %cst_72 {dimension_numbers = #tpu.dot_dimension_numbers<[1], [0], [0], [1], [0, 0, 1, 1], [], []>} : vector<8x128xbf16>, vector<128x512xbf16>, vector<8x512xf32> -> vector<8x512xf32>
    %167 = arith.addf %162, %166 : vector<8x512xf32>
    %168 = vector.extract_strided_slice %167 {offsets = [0, 0], sizes = [8, 128], strides = [1, 1]} : vector<8x512xf32> to vector<8x128xf32>
    %169 = arith.negf %168 : vector<8x128xf32>
    %170 = math.exp %169 : vector<8x128xf32>
    %cst_73 = arith.constant 1.000000e+00 : f32
    %171 = vector.broadcast %cst_73 : f32 to vector<8x128xf32>
    %172 = arith.addf %171, %170 : vector<8x128xf32>
    %173 = arith.divf %171, %172 : vector<8x128xf32>
    %174 = vector.extract_strided_slice %167 {offsets = [0, 128], sizes = [8, 128], strides = [1, 1]} : vector<8x512xf32> to vector<8x128xf32>
    %175 = arith.negf %174 : vector<8x128xf32>
    %176 = math.exp %175 : vector<8x128xf32>
    %cst_74 = arith.constant 1.000000e+00 : f32
    %177 = vector.broadcast %cst_74 : f32 to vector<8x128xf32>
    %178 = arith.addf %177, %176 : vector<8x128xf32>
    %179 = arith.divf %177, %178 : vector<8x128xf32>
    %180 = vector.extract_strided_slice %167 {offsets = [0, 256], sizes = [8, 128], strides = [1, 1]} : vector<8x512xf32> to vector<8x128xf32>
    %181 = math.tanh %180 : vector<8x128xf32>
    %182 = vector.extract_strided_slice %167 {offsets = [0, 384], sizes = [8, 128], strides = [1, 1]} : vector<8x512xf32> to vector<8x128xf32>
    %183 = arith.negf %182 : vector<8x128xf32>
    %184 = math.exp %183 : vector<8x128xf32>
    %cst_75 = arith.constant 1.000000e+00 : f32
    %185 = vector.broadcast %cst_75 : f32 to vector<8x128xf32>
    %186 = arith.addf %185, %184 : vector<8x128xf32>
    %187 = arith.divf %185, %186 : vector<8x128xf32>
    %188 = arith.mulf %179, %164 : vector<8x128xf32>
    %189 = arith.mulf %173, %181 : vector<8x128xf32>
    %190 = arith.addf %188, %189 : vector<8x128xf32>
    %191 = math.tanh %190 : vector<8x128xf32>
    %192 = arith.mulf %187, %191 : vector<8x128xf32>
    %c0_76 = arith.constant 0 : index
    %c0_77 = arith.constant 0 : index
    %193 = vector.load %arg7[%c0_76, %c0_77] : memref<8x128xf32, #tpu.memory_space<vmem>>, vector<8x128xf32>
    tpu.vector_store %arg7[%c0_76, %c0_77], %192 {strides = array<i32>} : memref<8x128xf32, #tpu.memory_space<vmem>>, vector<8x128xf32>,
    %c0_78 = arith.constant 0 : index
    %c0_79 = arith.constant 0 : index
    %194 = vector.load %arg8[%c0_78, %c0_79] : memref<8x128xf32, #tpu.memory_space<vmem>>, vector<8x128xf32>
    tpu.vector_store %arg8[%c0_78, %c0_79], %190 {strides = array<i32>} : memref<8x128xf32, #tpu.memory_space<vmem>>, vector<8x128xf32>,
    %195 = arith.index_cast %c4_i32 : i32 to index
    %c0_80 = arith.constant 0 : index
    %c0_81 = arith.constant 0 : index
    %196 = vector.load %arg9[%195, %c0_80, %c0_81] : memref<8x8x128xf32, #tpu.memory_space<vmem>>, vector<1x8x128xf32>
    %197 = vector.shape_cast %196 : vector<1x8x128xf32> to vector<8x128xf32>
    %198 = vector.shape_cast %192 : vector<8x128xf32> to vector<1x8x128xf32>
    tpu.vector_store %arg9[%195, %c0_80, %c0_81], %198 {strides = array<i32>} : memref<8x8x128xf32, #tpu.memory_space<vmem>>, vector<1x8x128xf32>,
    %c5_i32 = arith.constant 5 : i32
    %199 = arith.index_cast %c5_i32 : i32 to index
    %c0_82 = arith.constant 0 : index
    %c0_83 = arith.constant 0 : index
    %200 = vector.load %arg2[%199, %c0_82, %c0_83] : memref<8x8x512xf32, #tpu.memory_space<vmem>>, vector<1x8x512xf32>
    %201 = vector.shape_cast %200 : vector<1x8x512xf32> to vector<8x512xf32>
    %c0_84 = arith.constant 0 : index
    %c0_85 = arith.constant 0 : index
    %202 = vector.load %arg7[%c0_84, %c0_85] : memref<8x128xf32, #tpu.memory_space<vmem>>, vector<8x128xf32>
    %c0_86 = arith.constant 0 : index
    %c0_87 = arith.constant 0 : index
    %203 = vector.load %arg8[%c0_86, %c0_87] : memref<8x128xf32, #tpu.memory_space<vmem>>, vector<8x128xf32>
    %204 = arith.truncf %202 : vector<8x128xf32> to vector<8x128xbf16>
    %cst_88 = arith.constant dense<0.000000e+00> : vector<8x512xf32>
    %205 = tpu.matmul %204, %3, %cst_88 {dimension_numbers = #tpu.dot_dimension_numbers<[1], [0], [0], [1], [0, 0, 1, 1], [], []>} : vector<8x128xbf16>, vector<128x512xbf16>, vector<8x512xf32> -> vector<8x512xf32>
    %206 = arith.addf %201, %205 : vector<8x512xf32>
    %207 = vector.extract_strided_slice %206 {offsets = [0, 0], sizes = [8, 128], strides = [1, 1]} : vector<8x512xf32> to vector<8x128xf32>
    %208 = arith.negf %207 : vector<8x128xf32>
    %209 = math.exp %208 : vector<8x128xf32>
    %cst_89 = arith.constant 1.000000e+00 : f32
    %210 = vector.broadcast %cst_89 : f32 to vector<8x128xf32>
    %211 = arith.addf %210, %209 : vector<8x128xf32>
    %212 = arith.divf %210, %211 : vector<8x128xf32>
    %213 = vector.extract_strided_slice %206 {offsets = [0, 128], sizes = [8, 128], strides = [1, 1]} : vector<8x512xf32> to vector<8x128xf32>
    %214 = arith.negf %213 : vector<8x128xf32>
    %215 = math.exp %214 : vector<8x128xf32>
    %cst_90 = arith.constant 1.000000e+00 : f32
    %216 = vector.broadcast %cst_90 : f32 to vector<8x128xf32>
    %217 = arith.addf %216, %215 : vector<8x128xf32>
    %218 = arith.divf %216, %217 : vector<8x128xf32>
    %219 = vector.extract_strided_slice %206 {offsets = [0, 256], sizes = [8, 128], strides = [1, 1]} : vector<8x512xf32> to vector<8x128xf32>
    %220 = math.tanh %219 : vector<8x128xf32>
    %221 = vector.extract_strided_slice %206 {offsets = [0, 384], sizes = [8, 128], strides = [1, 1]} : vector<8x512xf32> to vector<8x128xf32>
    %222 = arith.negf %221 : vector<8x128xf32>
    %223 = math.exp %222 : vector<8x128xf32>
    %cst_91 = arith.constant 1.000000e+00 : f32
    %224 = vector.broadcast %cst_91 : f32 to vector<8x128xf32>
    %225 = arith.addf %224, %223 : vector<8x128xf32>
    %226 = arith.divf %224, %225 : vector<8x128xf32>
    %227 = arith.mulf %218, %203 : vector<8x128xf32>
    %228 = arith.mulf %212, %220 : vector<8x128xf32>
    %229 = arith.addf %227, %228 : vector<8x128xf32>
    %230 = math.tanh %229 : vector<8x128xf32>
    %231 = arith.mulf %226, %230 : vector<8x128xf32>
    %c0_92 = arith.constant 0 : index
    %c0_93 = arith.constant 0 : index
    %232 = vector.load %arg7[%c0_92, %c0_93] : memref<8x128xf32, #tpu.memory_space<vmem>>, vector<8x128xf32>
    tpu.vector_store %arg7[%c0_92, %c0_93], %231 {strides = array<i32>} : memref<8x128xf32, #tpu.memory_space<vmem>>, vector<8x128xf32>,
    %c0_94 = arith.constant 0 : index
    %c0_95 = arith.constant 0 : index
    %233 = vector.load %arg8[%c0_94, %c0_95] : memref<8x128xf32, #tpu.memory_space<vmem>>, vector<8x128xf32>
    tpu.vector_store %arg8[%c0_94, %c0_95], %229 {strides = array<i32>} : memref<8x128xf32, #tpu.memory_space<vmem>>, vector<8x128xf32>,
    %234 = arith.index_cast %c5_i32 : i32 to index
    %c0_96 = arith.constant 0 : index
    %c0_97 = arith.constant 0 : index
    %235 = vector.load %arg9[%234, %c0_96, %c0_97] : memref<8x8x128xf32, #tpu.memory_space<vmem>>, vector<1x8x128xf32>
    %236 = vector.shape_cast %235 : vector<1x8x128xf32> to vector<8x128xf32>
    %237 = vector.shape_cast %231 : vector<8x128xf32> to vector<1x8x128xf32>
    tpu.vector_store %arg9[%234, %c0_96, %c0_97], %237 {strides = array<i32>} : memref<8x8x128xf32, #tpu.memory_space<vmem>>, vector<1x8x128xf32>,
    %c6_i32 = arith.constant 6 : i32
    %238 = arith.index_cast %c6_i32 : i32 to index
    %c0_98 = arith.constant 0 : index
    %c0_99 = arith.constant 0 : index
    %239 = vector.load %arg2[%238, %c0_98, %c0_99] : memref<8x8x512xf32, #tpu.memory_space<vmem>>, vector<1x8x512xf32>
    %240 = vector.shape_cast %239 : vector<1x8x512xf32> to vector<8x512xf32>
    %c0_100 = arith.constant 0 : index
    %c0_101 = arith.constant 0 : index
    %241 = vector.load %arg7[%c0_100, %c0_101] : memref<8x128xf32, #tpu.memory_space<vmem>>, vector<8x128xf32>
    %c0_102 = arith.constant 0 : index
    %c0_103 = arith.constant 0 : index
    %242 = vector.load %arg8[%c0_102, %c0_103] : memref<8x128xf32, #tpu.memory_space<vmem>>, vector<8x128xf32>
    %243 = arith.truncf %241 : vector<8x128xf32> to vector<8x128xbf16>
    %cst_104 = arith.constant dense<0.000000e+00> : vector<8x512xf32>
    %244 = tpu.matmul %243, %3, %cst_104 {dimension_numbers = #tpu.dot_dimension_numbers<[1], [0], [0], [1], [0, 0, 1, 1], [], []>} : vector<8x128xbf16>, vector<128x512xbf16>, vector<8x512xf32> -> vector<8x512xf32>
    %245 = arith.addf %240, %244 : vector<8x512xf32>
    %246 = vector.extract_strided_slice %245 {offsets = [0, 0], sizes = [8, 128], strides = [1, 1]} : vector<8x512xf32> to vector<8x128xf32>
    %247 = arith.negf %246 : vector<8x128xf32>
    %248 = math.exp %247 : vector<8x128xf32>
    %cst_105 = arith.constant 1.000000e+00 : f32
    %249 = vector.broadcast %cst_105 : f32 to vector<8x128xf32>
    %250 = arith.addf %249, %248 : vector<8x128xf32>
    %251 = arith.divf %249, %250 : vector<8x128xf32>
    %252 = vector.extract_strided_slice %245 {offsets = [0, 128], sizes = [8, 128], strides = [1, 1]} : vector<8x512xf32> to vector<8x128xf32>
    %253 = arith.negf %252 : vector<8x128xf32>
    %254 = math.exp %253 : vector<8x128xf32>
    %cst_106 = arith.constant 1.000000e+00 : f32
    %255 = vector.broadcast %cst_106 : f32 to vector<8x128xf32>
    %256 = arith.addf %255, %254 : vector<8x128xf32>
    %257 = arith.divf %255, %256 : vector<8x128xf32>
    %258 = vector.extract_strided_slice %245 {offsets = [0, 256], sizes = [8, 128], strides = [1, 1]} : vector<8x512xf32> to vector<8x128xf32>
    %259 = math.tanh %258 : vector<8x128xf32>
    %260 = vector.extract_strided_slice %245 {offsets = [0, 384], sizes = [8, 128], strides = [1, 1]} : vector<8x512xf32> to vector<8x128xf32>
    %261 = arith.negf %260 : vector<8x128xf32>
    %262 = math.exp %261 : vector<8x128xf32>
    %cst_107 = arith.constant 1.000000e+00 : f32
    %263 = vector.broadcast %cst_107 : f32 to vector<8x128xf32>
    %264 = arith.addf %263, %262 : vector<8x128xf32>
    %265 = arith.divf %263, %264 : vector<8x128xf32>
    %266 = arith.mulf %257, %242 : vector<8x128xf32>
    %267 = arith.mulf %251, %259 : vector<8x128xf32>
    %268 = arith.addf %266, %267 : vector<8x128xf32>
    %269 = math.tanh %268 : vector<8x128xf32>
    %270 = arith.mulf %265, %269 : vector<8x128xf32>
    %c0_108 = arith.constant 0 : index
    %c0_109 = arith.constant 0 : index
    %271 = vector.load %arg7[%c0_108, %c0_109] : memref<8x128xf32, #tpu.memory_space<vmem>>, vector<8x128xf32>
    tpu.vector_store %arg7[%c0_108, %c0_109], %270 {strides = array<i32>} : memref<8x128xf32, #tpu.memory_space<vmem>>, vector<8x128xf32>,
    %c0_110 = arith.constant 0 : index
    %c0_111 = arith.constant 0 : index
    %272 = vector.load %arg8[%c0_110, %c0_111] : memref<8x128xf32, #tpu.memory_space<vmem>>, vector<8x128xf32>
    tpu.vector_store %arg8[%c0_110, %c0_111], %268 {strides = array<i32>} : memref<8x128xf32, #tpu.memory_space<vmem>>, vector<8x128xf32>,
    %273 = arith.index_cast %c6_i32 : i32 to index
    %c0_112 = arith.constant 0 : index
    %c0_113 = arith.constant 0 : index
    %274 = vector.load %arg9[%273, %c0_112, %c0_113] : memref<8x8x128xf32, #tpu.memory_space<vmem>>, vector<1x8x128xf32>
    %275 = vector.shape_cast %274 : vector<1x8x128xf32> to vector<8x128xf32>
    %276 = vector.shape_cast %270 : vector<8x128xf32> to vector<1x8x128xf32>
    tpu.vector_store %arg9[%273, %c0_112, %c0_113], %276 {strides = array<i32>} : memref<8x8x128xf32, #tpu.memory_space<vmem>>, vector<1x8x128xf32>,
    %c7_i32 = arith.constant 7 : i32
    %277 = arith.index_cast %c7_i32 : i32 to index
    %c0_114 = arith.constant 0 : index
    %c0_115 = arith.constant 0 : index
    %278 = vector.load %arg2[%277, %c0_114, %c0_115] : memref<8x8x512xf32, #tpu.memory_space<vmem>>, vector<1x8x512xf32>
    %279 = vector.shape_cast %278 : vector<1x8x512xf32> to vector<8x512xf32>
    %c0_116 = arith.constant 0 : index
    %c0_117 = arith.constant 0 : index
    %280 = vector.load %arg7[%c0_116, %c0_117] : memref<8x128xf32, #tpu.memory_space<vmem>>, vector<8x128xf32>
    %c0_118 = arith.constant 0 : index
    %c0_119 = arith.constant 0 : index
    %281 = vector.load %arg8[%c0_118, %c0_119] : memref<8x128xf32, #tpu.memory_space<vmem>>, vector<8x128xf32>
    %282 = arith.truncf %280 : vector<8x128xf32> to vector<8x128xbf16>
    %cst_120 = arith.constant dense<0.000000e+00> : vector<8x512xf32>
    %283 = tpu.matmul %282, %3, %cst_120 {dimension_numbers = #tpu.dot_dimension_numbers<[1], [0], [0], [1], [0, 0, 1, 1], [], []>} : vector<8x128xbf16>, vector<128x512xbf16>, vector<8x512xf32> -> vector<8x512xf32>
    %284 = arith.addf %279, %283 : vector<8x512xf32>
    %285 = vector.extract_strided_slice %284 {offsets = [0, 0], sizes = [8, 128], strides = [1, 1]} : vector<8x512xf32> to vector<8x128xf32>
    %286 = arith.negf %285 : vector<8x128xf32>
    %287 = math.exp %286 : vector<8x128xf32>
    %cst_121 = arith.constant 1.000000e+00 : f32
    %288 = vector.broadcast %cst_121 : f32 to vector<8x128xf32>
    %289 = arith.addf %288, %287 : vector<8x128xf32>
    %290 = arith.divf %288, %289 : vector<8x128xf32>
    %291 = vector.extract_strided_slice %284 {offsets = [0, 128], sizes = [8, 128], strides = [1, 1]} : vector<8x512xf32> to vector<8x128xf32>
    %292 = arith.negf %291 : vector<8x128xf32>
    %293 = math.exp %292 : vector<8x128xf32>
    %cst_122 = arith.constant 1.000000e+00 : f32
    %294 = vector.broadcast %cst_122 : f32 to vector<8x128xf32>
    %295 = arith.addf %294, %293 : vector<8x128xf32>
    %296 = arith.divf %294, %295 : vector<8x128xf32>
    %297 = vector.extract_strided_slice %284 {offsets = [0, 256], sizes = [8, 128], strides = [1, 1]} : vector<8x512xf32> to vector<8x128xf32>
    %298 = math.tanh %297 : vector<8x128xf32>
    %299 = vector.extract_strided_slice %284 {offsets = [0, 384], sizes = [8, 128], strides = [1, 1]} : vector<8x512xf32> to vector<8x128xf32>
    %300 = arith.negf %299 : vector<8x128xf32>
    %301 = math.exp %300 : vector<8x128xf32>
    %cst_123 = arith.constant 1.000000e+00 : f32
    %302 = vector.broadcast %cst_123 : f32 to vector<8x128xf32>
    %303 = arith.addf %302, %301 : vector<8x128xf32>
    %304 = arith.divf %302, %303 : vector<8x128xf32>
    %305 = arith.mulf %296, %281 : vector<8x128xf32>
    %306 = arith.mulf %290, %298 : vector<8x128xf32>
    %307 = arith.addf %305, %306 : vector<8x128xf32>
    %308 = math.tanh %307 : vector<8x128xf32>
    %309 = arith.mulf %304, %308 : vector<8x128xf32>
    %c0_124 = arith.constant 0 : index
    %c0_125 = arith.constant 0 : index
    %310 = vector.load %arg7[%c0_124, %c0_125] : memref<8x128xf32, #tpu.memory_space<vmem>>, vector<8x128xf32>
    tpu.vector_store %arg7[%c0_124, %c0_125], %309 {strides = array<i32>} : memref<8x128xf32, #tpu.memory_space<vmem>>, vector<8x128xf32>,
    %c0_126 = arith.constant 0 : index
    %c0_127 = arith.constant 0 : index
    %311 = vector.load %arg8[%c0_126, %c0_127] : memref<8x128xf32, #tpu.memory_space<vmem>>, vector<8x128xf32>
    tpu.vector_store %arg8[%c0_126, %c0_127], %307 {strides = array<i32>} : memref<8x128xf32, #tpu.memory_space<vmem>>, vector<8x128xf32>,
    %312 = arith.index_cast %c7_i32 : i32 to index
    %c0_128 = arith.constant 0 : index
    %c0_129 = arith.constant 0 : index
    %313 = vector.load %arg9[%312, %c0_128, %c0_129] : memref<8x8x128xf32, #tpu.memory_space<vmem>>, vector<1x8x128xf32>
    %314 = vector.shape_cast %313 : vector<1x8x128xf32> to vector<8x128xf32>
    %315 = vector.shape_cast %309 : vector<8x128xf32> to vector<1x8x128xf32>
    tpu.vector_store %arg9[%312, %c0_128, %c0_129], %315 {strides = array<i32>} : memref<8x8x128xf32, #tpu.memory_space<vmem>>, vector<1x8x128xf32>,
    %c8_i32 = arith.constant 8 : i32
    %c0_130 = arith.constant 0 : index
    %c0_131 = arith.constant 0 : index
    %c0_132 = arith.constant 0 : index
    %316 = vector.load %arg9[%c0_130, %c0_131, %c0_132] : memref<8x8x128xf32, #tpu.memory_space<vmem>>, vector<8x8x128xf32>
    %317 = vector.shape_cast %316 : vector<8x8x128xf32> to vector<64x128xf32>
    %318 = arith.truncf %317 : vector<64x128xf32> to vector<64x128xbf16>
    %c0_133 = arith.constant 0 : index
    %c0_134 = arith.constant 0 : index
    %319 = vector.load %arg4[%c0_133, %c0_134] : memref<128x32xbf16, #tpu.memory_space<vmem>>, vector<128x32xbf16>
    %cst_135 = arith.constant dense<0.000000e+00> : vector<64x32xf32>
    %320 = tpu.matmul %318, %319, %cst_135 {dimension_numbers = #tpu.dot_dimension_numbers<[1], [0], [0], [1], [0, 0, 1, 1], [], []>} : vector<64x128xbf16>, vector<128x32xbf16>, vector<64x32xf32> -> vector<64x32xf32>
    %c0_136 = arith.constant 0 : index
    %c0_137 = arith.constant 0 : index
    %321 = vector.load %arg5[%c0_136, %c0_137] : memref<1x32xf32, #tpu.memory_space<vmem>>, vector<1x32xf32>
    %322 = vector.broadcast %321 : vector<1x32xf32> to vector<64x32xf32>
    %323 = arith.addf %320, %322 : vector<64x32xf32>
    %324 = vector.shape_cast %323 : vector<64x32xf32> to vector<8x8x32xf32>
    %c0_138 = arith.constant 0 : index
    %c0_139 = arith.constant 0 : index
    %c0_140 = arith.constant 0 : index
    %325 = vector.load %arg6[%c0_138, %c0_139, %c0_140] : memref<8x8x32xf32, #tpu.memory_space<vmem>>, vector<8x8x32xf32>
    tpu.vector_store %arg6[%c0_138, %c0_139, %c0_140], %324 {strides = array<i32>} : memref<8x8x32xf32, #tpu.memory_space<vmem>>, vector<8x8x32xf32>,
    return
  }
  func.func @transform_0(%arg0: i32, %arg1: i32) -> (i32, i32, i32) {
    %c0_i32 = arith.constant 0 : i32
    %c0_i32_0 = arith.constant 0 : i32
    return %arg1, %arg0, %c0_i32 : i32, i32, i32
  }
  func.func @transform_1(%arg0: i32, %arg1: i32) -> (i32, i32) {
    %c0_i32 = arith.constant 0 : i32
    %c0_i32_0 = arith.constant 0 : i32
    %c0_i32_1 = arith.constant 0 : i32
    return %c0_i32, %c0_i32_0 : i32, i32
  }
  func.func @transform_2(%arg0: i32, %arg1: i32) -> (i32, i32) {
    %c0_i32 = arith.constant 0 : i32
    %c0_i32_0 = arith.constant 0 : i32
    %c0_i32_1 = arith.constant 0 : i32
    return %c0_i32, %c0_i32_0 : i32, i32
  }
  func.func @transform_3(%arg0: i32, %arg1: i32) -> (i32, i32) {
    %c0_i32 = arith.constant 0 : i32
    %c0_i32_0 = arith.constant 0 : i32
    %c0_i32_1 = arith.constant 0 : i32
    return %c0_i32, %c0_i32_0 : i32, i32
  }
  func.func @transform_4(%arg0: i32, %arg1: i32) -> (i32, i32, i32) {
    %c0_i32 = arith.constant 0 : i32
    %c0_i32_0 = arith.constant 0 : i32
    return %arg1, %arg0, %c0_i32 : i32, i32, i32
  }
}

</mosaic_0001>

<bundles_post_ra>
// kernel: _lambda_.1
= control target key start
LH: loop header
LB: loop body
LE: loop exit
PB: predicated region body
PF: predicated region fallthrough
CT: control target
= control target key end

     0   :  { %s2344_s15 = smov 0   ;;  %s2346_s16 = smov 0   ;;  %s3193_s0 = inlined_call_operand.vmem [shape: f32[16,16,512], index: 0, kind: input, shape index: {}]   ;;  %s3194_s1 = inlined_call_operand.vmem [shape: bf16[128,512], index: 1, kind: input, shape index: {}]   ;;  %s3195_s2 = inlined_call_operand.vmem [shape: bf16[128,32], index: 2, kind: input, shape index: {}]   ;;  %s3196_s3 = inlined_call_operand.vmem [shape: f32[1,32], index: 3, kind: input, shape index: {}]   ;;  %s3197_s4 = inlined_call_operand.vmem [shape: f32[16,16,32], index: 4, kind: output, shape index: {}]  }
   0x1   :  { %s2348_s17 = smov 0   ;;  %s2350_s18 = smov 0  }
   0x2   :  { %s2352_s19 = smov 0   ;;  %s2354_s20 = smov 0  }
   0x3   :  { %s2356_s21 = smov 0  }
   0x4 LB: > { %s23_s22 = sadd.s32 1, %s2308_s19  ;;  %s26_s23 = sadd.s32 1, %s2312_s20  ;;  %s2316_s21 = sphi %s2356_s21, %s14_s21   ;;  %s2312_s20 = sphi %s2354_s20, %s3208_s20   ;;  %s2308_s19 = sphi %s2352_s19, %s3207_s19   ;;  %s2304_s18 = sphi %s2350_s18, %s3206_s18   ;;  %s2300_s17 = sphi %s2348_s17, %s3205_s17   ;;  %s2296_s16 = sphi %s2346_s16, %s3204_s16   ;;  %s2292_s15 = sphi %s2344_s15, %s3203_s15  }
   0x5   : > { %p24_p0 = scmp.ge.s32.totalorder %s23_s22, 2  ;;  %s1803_s24 = sadd.s32 4294967295, %s2316_s21  }
   0x6   : > { %p42_p1 = scmp.ne.s32.totalorder %s2296_s16, %s2292_s15  ;;  %p43_p2 = scmp.eq.s32.totalorder %s2316_s21, 0 }
   0x7   : > { %s3210_s22 = smov (%p24_p0, %s23_s22), 0  ;;  %s3212_s23 = smov (!%p24_p0, %s26_s23), %s2312_s20 }
   0x8   : > { %p28_p3 = scmp.ge.s32.totalorder %s3212_s23, 2  ;;  %p137_p4 = scmp.eq.s32.totalorder %s1803_s24, 3 }
   0x9   : > { %s30_s25 = ssub.s32 %s2308_s19, %s3210_s22  ;;  %p44_p5 = por %p43_p2, %p42_p1 }
   0xa   : > { %s3214_s23 = smov (%p28_p3, %s3212_s23), 0  ;;  %p2392_p6 = por %p137_p4, %p42_p1 }
   0xb   : > { %s31_s27 = ssub.s32 %s2312_s20, %s3214_s23  ;;  %s35_s29 = sadd.s32 1, %s2296_s16 }
   0xc   : > { %s32_s28 = sor.u32 %s31_s27, %s30_s25  ;;  %p1806_p8 = scmp.ge.s32.totalorder %s2316_s21, 4 }
   0xd   : > { %p33_p7 = scmp.eq.s32.totalorder %s32_s28, 0 }
   0xe   : > { %168 = sbr.rel (%p1806_p8) target bundleno = 58 (0x3a), region = 28 }
   0xf   : > { %s2400_s30 = scalar_select %p33_p7, %s2296_s16, %s35_s29  }
  0x13   : > { %171 = sbr.rel (!%p44_p5) target bundleno = 58 (0x3a), region = 32  ;;  %s173_s5 = sand.u32 (%p44_p5), 1, %s2296_s16  }
  0x14   : > { %s1809_s6 = sshll.u32 (%p44_p5), %s2312_s20, 2  ;;  %s1807_s7 = sshll.u32 (%p44_p5), %s173_s5, 8 }
  0x15   : > { %s2034_s8 = sshll.u32 (%p44_p5), %s2308_s19, 6  ;;  %s2414_s14 = scalar_lea.vmem (%p44_p5), [#allocation5], %s1807_s7 }
  0x16   : > { %s179_s9 = sadd.s32 (%p44_p5), %s2034_s8, %s1809_s6 }
  0x17   : > { %s1811_s10 = sshll.u32 (%p44_p5), %s179_s9, 3 }
  0x18   : > { %s2409_s13 = scalar_lea.vmem %s3193_s0, %s1811_s10 }
  0x19   : > { %v194_v0 = vld [vmem:[%s2409_s13] sm:$0xff]  ;;  %v196_v1 = vld [vmem:[%s2409_s13 + $0x8] sm:$0xff]  ;;  %v198_v2 = vld [vmem:[%s2409_s13 + $0x10] sm:$0xff] }
  0x1a   : > { %195 = vst [vmem:[%s2414_s14] sm:$0xff] %v194_v0  ;;  %v200_v3 = vld [vmem:[%s2409_s13 + $0x18] sm:$0xff]  ;;  %v202_v4 = vld [vmem:[%s2409_s13 + $0x40] sm:$0xff]  ;;  %v204_v5 = vld [vmem:[%s2409_s13 + $0x48] sm:$0xff] }
  0x1b   : > { %197 = vst [vmem:[%s2414_s14 + $0x8] sm:$0xff] %v196_v1  ;;  %v206_v6 = vld [vmem:[%s2409_s13 + $0x50] sm:$0xff]  ;;  %v208_v7 = vld [vmem:[%s2409_s13 + $0x58] sm:$0xff]  ;;  %v210_v8 = vld [vmem:[%s2409_s13 + $0x80] sm:$0xff] }
  0x1c   : > { %199 = vst [vmem:[%s2414_s14 + $0x10] sm:$0xff] %v198_v2  ;;  %v212_v9 = vld [vmem:[%s2409_s13 + $0x88] sm:$0xff]  ;;  %v214_v10 = vld [vmem:[%s2409_s13 + $0x90] sm:$0xff]  ;;  %v216_v11 = vld [vmem:[%s2409_s13 + $0x98] sm:$0xff] }
  0x1d   : > { %201 = vst [vmem:[%s2414_s14 + $0x18] sm:$0xff] %v200_v3  ;;  %v218_v12 = vld [vmem:[%s2409_s13 + $0xc0] sm:$0xff]  ;;  %v220_v13 = vld [vmem:[%s2409_s13 + $0xc8] sm:$0xff]  ;;  %v222_v14 = vld [vmem:[%s2409_s13 + $0xd0] sm:$0xff] }
  0x1e   : > { %203 = vst [vmem:[%s2414_s14 + $0x20] sm:$0xff] %v202_v4  ;;  %v224_v15 = vld [vmem:[%s2409_s13 + $0xd8] sm:$0xff]  ;;  %v226_v16 = vld [vmem:[%s2409_s13 + $0x100] sm:$0xff]  ;;  %v228_v17 = vld [vmem:[%s2409_s13 + $0x108] sm:$0xff] }
  0x1f   : > { %205 = vst [vmem:[%s2414_s14 + $0x28] sm:$0xff] %v204_v5  ;;  %v230_v18 = vld [vmem:[%s2409_s13 + $0x110] sm:$0xff]  ;;  %v232_v19 = vld [vmem:[%s2409_s13 + $0x118] sm:$0xff]  ;;  %v234_v20 = vld [vmem:[%s2409_s13 + $0x140] sm:$0xff] }
  0x20   : > { %207 = vst [vmem:[%s2414_s14 + $0x30] sm:$0xff] %v206_v6  ;;  %v236_v21 = vld [vmem:[%s2409_s13 + $0x148] sm:$0xff]  ;;  %v238_v22 = vld [vmem:[%s2409_s13 + $0x150] sm:$0xff]  ;;  %v240_v23 = vld [vmem:[%s2409_s13 + $0x158] sm:$0xff] }
  0x21   : > { %209 = vst [vmem:[%s2414_s14 + $0x38] sm:$0xff] %v208_v7  ;;  %v242_v24 = vld [vmem:[%s2409_s13 + $0x180] sm:$0xff]  ;;  %v244_v25 = vld [vmem:[%s2409_s13 + $0x188] sm:$0xff]  ;;  %v246_v26 = vld [vmem:[%s2409_s13 + $0x190] sm:$0xff] }
  0x22   : > { %211 = vst [vmem:[%s2414_s14 + $0x40] sm:$0xff] %v210_v8  ;;  %v248_v27 = vld [vmem:[%s2409_s13 + $0x198] sm:$0xff]  ;;  %v250_v28 = vld [vmem:[%s2409_s13 + $0x1c0] sm:$0xff]  ;;  %v252_v29 = vld [vmem:[%s2409_s13 + $0x1c8] sm:$0xff] }
  0x23   : > { %213 = vst [vmem:[%s2414_s14 + $0x48] sm:$0xff] %v212_v9  ;;  %v254_v30 = vld [vmem:[%s2409_s13 + $0x1d0] sm:$0xff]  ;;  %v256_v31 = vld [vmem:[%s2409_s13 + $0x1d8] sm:$0xff] }
  0x24   : > { %215 = vst [vmem:[%s2414_s14 + $0x50] sm:$0xff] %v214_v10 }
  0x25   : > { %217 = vst [vmem:[%s2414_s14 + $0x58] sm:$0xff] %v216_v11 }
  0x26   : > { %219 = vst [vmem:[%s2414_s14 + $0x60] sm:$0xff] %v218_v12 }
  0x27   : > { %221 = vst [vmem:[%s2414_s14 + $0x68] sm:$0xff] %v220_v13 }
  0x28   : > { %223 = vst [vmem:[%s2414_s14 + $0x70] sm:$0xff] %v222_v14 }
  0x29   : > { %225 = vst [vmem:[%s2414_s14 + $0x78] sm:$0xff] %v224_v15 }
  0x2a   : > { %227 = vst [vmem:[%s2414_s14 + $0x80] sm:$0xff] %v226_v16 }
  0x2b   : > { %229 = vst [vmem:[%s2414_s14 + $0x88] sm:$0xff] %v228_v17 }
  0x2c   : > { %231 = vst [vmem:[%s2414_s14 + $0x90] sm:$0xff] %v230_v18 }
  0x2d   : > { %233 = vst [vmem:[%s2414_s14 + $0x98] sm:$0xff] %v232_v19 }
  0x2e   : > { %235 = vst [vmem:[%s2414_s14 + $0xa0] sm:$0xff] %v234_v20 }
  0x2f   : > { %237 = vst [vmem:[%s2414_s14 + $0xa8] sm:$0xff] %v236_v21 }
  0x30   : > { %239 = vst [vmem:[%s2414_s14 + $0xb0] sm:$0xff] %v238_v22 }
  0x31   : > { %241 = vst [vmem:[%s2414_s14 + $0xb8] sm:$0xff] %v240_v23 }
  0x32   : > { %243 = vst [vmem:[%s2414_s14 + $0xc0] sm:$0xff] %v242_v24 }
  0x33   : > { %245 = vst [vmem:[%s2414_s14 + $0xc8] sm:$0xff] %v244_v25 }
  0x34   : > { %247 = vst [vmem:[%s2414_s14 + $0xd0] sm:$0xff] %v246_v26 }
  0x35   : > { %249 = vst [vmem:[%s2414_s14 + $0xd8] sm:$0xff] %v248_v27 }
  0x36   : > { %251 = vst [vmem:[%s2414_s14 + $0xe0] sm:$0xff] %v250_v28 }
  0x37   : > { %253 = vst [vmem:[%s2414_s14 + $0xe8] sm:$0xff] %v252_v29 }
  0x38   : > { %255 = vst [vmem:[%s2414_s14 + $0xf0] sm:$0xff] %v254_v30 }
  0x39   : > { %257 = vst [vmem:[%s2414_s14 + $0xf8] sm:$0xff] %v256_v31 }
  0x3a PF: > { %p1812_p9 = scmp.ge.s32.totalorder %s2316_s21, 1  ;;  %p262_p10 = scmp.lt.s32.totalorder %s2316_s21, 5 }
  0x3c   : > { %p263_p11 = pnand %p1812_p9, %p262_p10 }
  0x3d   : > { %s269_s24 = sand.u32 (!%p263_p11), 1, %s2292_s15   ;;  %p1815_p12 = scmp.ne.s32.totalorder (!%p263_p11), %s2300_s17, 0 }
  0x3e   : > { %266 = sbr.rel (%p263_p11) target bundleno = 1666 (0x682), region = 55  ;;  %s1813_s25 = sshll.u32 (!%p263_p11), %s269_s24, 8 }
  0x3f   : > { %s1814_s27 = sshll.u32 (!%p263_p11), %s269_s24, 6  ;;  %s2480_s28 = scalar_lea.vmem (!%p263_p11), [#allocation5], %s1813_s25 }
  0x40   : > { %s2482_s29 = scalar_lea.vmem (!%p263_p11), [#allocation6], %s1814_s27 }
  0x43   : > { %298 = sbr.rel (%p1815_p12) target bundleno = 75 (0x4b), region = 63 }
  0x48   : > { %v2318_v32 = vmov 0.0  }
  0x49   : > { %299 = vst [vmem:[#allocation2] sm:$0xff] %v2318_v32 }
  0x4a   : > { %300 = vst [vmem:[#allocation3] sm:$0xff] %v2318_v32 }
  0x4b PF: > { %v1930_v33 = vld [vmem:[%s3194_s1 + $0xe0] sm:$0xf]  ;;  %v2065_v34 = vld [vmem:[%s3194_s1 + $0xec] sm:$0xf0]  ;;  %v1938_v38 = vld [vmem:[%s3194_s1 + $0xe8] sm:$0xf] }
  0x4c   : > { %v1914_v35 = vld [vmem:[%s3194_s1 + $0xc0] sm:$0xf]  ;;  %v2494_v36 = vor.u32 %v2065_v34, %v1930_v33  ;;  %v2061_v37 = vld [vmem:[%s3194_s1 + $0xcc] sm:$0xf0]  ;;  %v2066_v41 = vld [vmem:[%s3194_s1 + $0xf4] sm:$0xf0] }
  0x4d   : > { %v2503_v39 = vor.u32 %v2061_v37, %v1914_v35  ;;  %v1898_v40 = vld [vmem:[%s3194_s1 + $0xa0] sm:$0xf]  ;;  %v2057_v42 = vld [vmem:[%s3194_s1 + $0xac] sm:$0xf0]  ;;  %v2515_v43 = vor.u32 %v2066_v41, %v1938_v38  ;;  %v1922_v44 = vld [vmem:[%s3194_s1 + $0xc8] sm:$0xf] }
  0x4e   : > { %500 = vmatpush.bf16.msra.mxu1 %v2494_v36  ;;  %761 = vmatpush.bf16.msra.mxu0 %v2494_v36  ;;  %v2062_v45 = vld [vmem:[%s3194_s1 + $0xd4] sm:$0xf0]  ;;  %v2064_v46 = vld [vmem:[%s3194_s1 + $0xec] sm:$0xf]  ;;  %v1940_v47 = vld [vmem:[%s3194_s1 + $0xf8] sm:$0xf0]  ;;  %v2538_v51 = vor.u32 %v2057_v42, %v1898_v40 }
  0x4f   : > { %526 = vmatpush.bf16.msra.mxu2 %v2515_v43  ;;  %v2530_v48 = vor.u32 %v2062_v45, %v1922_v44  ;;  %v2532_v49 = vor.u32 %v2064_v46, %v1940_v47  ;;  %v1906_v50 = vld [vmem:[%s3194_s1 + $0xa8] sm:$0xf]  ;;  %v2058_v52 = vld [vmem:[%s3194_s1 + $0xb4] sm:$0xf0]  ;;  %v2060_v53 = vld [vmem:[%s3194_s1 + $0xcc] sm:$0xf] }
  0x50   : > { %v1924_v54 = vld [vmem:[%s3194_s1 + $0xd8] sm:$0xf0]  ;;  %v1882_v55 = vld [vmem:[%s3194_s1 + $0x80] sm:$0xf]  ;;  %v2053_v56 = vld [vmem:[%s3194_s1 + $0x8c] sm:$0xf0]  ;;  %v2560_v58 = vor.u32 %v2058_v52, %v1906_v50 }
  0x51   : > { %539 = vmatpush.bf16.msra.mxu3 %v2532_v49  ;;  %v2557_v57 = vor.u32 %v2060_v53, %v1924_v54  ;;  %v2056_v59 = vld [vmem:[%s3194_s1 + $0xac] sm:$0xf]  ;;  %v1908_v60 = vld [vmem:[%s3194_s1 + $0xb8] sm:$0xf0]  ;;  %v2569_v61 = vor.u32 %v2053_v56, %v1882_v55  ;;  %v1890_v62 = vld [vmem:[%s3194_s1 + $0x88] sm:$0xf] }
  0x52   : > { %501 = vmatpush.bf16.msra.mxu1 %v2503_v39  ;;  %762 = vmatpush.bf16.msra.mxu0 %v2503_v39  ;;  %v2054_v63 = vld [vmem:[%s3194_s1 + $0x94] sm:$0xf0]  ;;  %v1866_v0 = vld [vmem:[%s3194_s1 + $0x60] sm:$0xf]  ;;  %v2049_v1 = vld [vmem:[%s3194_s1 + $0x6c] sm:$0xf0]  ;;  %v2585_v2 = vor.u32 %v2056_v59, %v1908_v60 }
  0x53   : > { %527 = vmatpush.bf16.msra.mxu2 %v2530_v48  ;;  %v2052_v3 = vld [vmem:[%s3194_s1 + $0x8c] sm:$0xf]  ;;  %v1892_v4 = vld [vmem:[%s3194_s1 + $0x98] sm:$0xf0]  ;;  %v2594_v5 = vor.u32 %v2054_v63, %v1890_v62  ;;  %v2597_v6 = vor.u32 %v2049_v1, %v1866_v0  ;;  %v1874_v7 = vld [vmem:[%s3194_s1 + $0x68] sm:$0xf] }
  0x54   : > { %v2050_v8 = vld [vmem:[%s3194_s1 + $0x74] sm:$0xf0]  ;;  %v1850_v9 = vld [vmem:[%s3194_s1 + $0x40] sm:$0xf]  ;;  %v2045_v10 = vld [vmem:[%s3194_s1 + $0x4c] sm:$0xf0]  ;;  %v2613_v11 = vor.u32 %v2052_v3, %v1892_v4 }
  0x55   : > { %540 = vmatpush.bf16.msra.mxu3 %v2557_v57  ;;  %v2048_v12 = vld [vmem:[%s3194_s1 + $0x6c] sm:$0xf]  ;;  %v1876_v13 = vld [vmem:[%s3194_s1 + $0x78] sm:$0xf0]  ;;  %v2622_v14 = vor.u32 %v2050_v8, %v1874_v7  ;;  %v2625_v15 = vor.u32 %v2045_v10, %v1850_v9  ;;  %v1858_v16 = vld [vmem:[%s3194_s1 + $0x48] sm:$0xf] }
  0x56   : > { %502 = vmatpush.bf16.msra.mxu1 %v2538_v51  ;;  %763 = vmatpush.bf16.msra.mxu0 %v2538_v51  ;;  %v2046_v17 = vld [vmem:[%s3194_s1 + $0x54] sm:$0xf0]  ;;  %v1834_v18 = vld [vmem:[%s3194_s1 + $0x20] sm:$0xf]  ;;  %v2041_v19 = vld [vmem:[%s3194_s1 + $0x2c] sm:$0xf0]  ;;  %v2641_v20 = vor.u32 %v2048_v12, %v1876_v13 }
  0x57   : > { %528 = vmatpush.bf16.msra.mxu2 %v2560_v58  ;;  %v2044_v21 = vld [vmem:[%s3194_s1 + $0x4c] sm:$0xf]  ;;  %v1860_v22 = vld [vmem:[%s3194_s1 + $0x58] sm:$0xf0]  ;;  %v2650_v23 = vor.u32 %v2046_v17, %v1858_v16  ;;  %v2653_v24 = vor.u32 %v2041_v19, %v1834_v18  ;;  %v1842_v25 = vld [vmem:[%s3194_s1 + $0x28] sm:$0xf] }
  0x58   : > { %v2042_v26 = vld [vmem:[%s3194_s1 + $0x34] sm:$0xf0]  ;;  %v1818_v27 = vld [vmem:[%s3194_s1] sm:$0xf]  ;;  %v2037_v28 = vld [vmem:[%s3194_s1 + $0xc] sm:$0xf0]  ;;  %v2672_v30 = vor.u32 %v2044_v21, %v1860_v22 }
  0x59   : > { %541 = vmatpush.bf16.msra.mxu3 %v2585_v2  ;;  %v2063_v29 = vld [vmem:[%s3194_s1 + $0xe4] sm:$0xf]  ;;  %v1932_v31 = vld [vmem:[%s3194_s1 + $0xf0] sm:$0xf0]  ;;  %v2040_v32 = vld [vmem:[%s3194_s1 + $0x2c] sm:$0xf]  ;;  %v2684_v34 = vor.u32 %v2042_v26, %v1842_v25  ;;  %v2687_v35 = vor.u32 %v2037_v28, %v1818_v27 }
  0x5a   : > { %503 = vmatpush.bf16.msra.mxu1 %v2569_v61  ;;  %764 = vmatpush.bf16.msra.mxu0 %v2569_v61  ;;  %v1844_v33 = vld [vmem:[%s3194_s1 + $0x38] sm:$0xf0]  ;;  %v337_v37 = vld [vmem:[#allocation2] sm:$0xff]  ;;  %v1826_v38 = vld [vmem:[%s3194_s1 + $0x8] sm:$0xf]  ;;  %v2696_v41 = vor.u32 %v2063_v29, %v1932_v31 }
  0x5b   : > { %529 = vmatpush.bf16.msra.mxu2 %v2594_v5  ;;  %v2038_v40 = vld [vmem:[%s3194_s1 + $0x14] sm:$0xf0]  ;;  %v2059_v42 = vld [vmem:[%s3194_s1 + $0xc4] sm:$0xf]  ;;  %v2702_v44 = vor.u32 %v2040_v32, %v1844_v33  ;;  %v1916_v45 = vld [vmem:[%s3194_s1 + $0xd0] sm:$0xf0]  ;;  %v339_v50 = vpack.c.bf16 %v337_v37, %v337_v37 }
  0x5c   : > { %v2036_v46 = vld [vmem:[%s3194_s1 + $0xc] sm:$0xf]  ;;  %v1828_v47 = vld [vmem:[%s3194_s1 + $0x18] sm:$0xf0]  ;;  %v2714_v52 = vor.u32 %v2038_v40, %v1826_v38  ;;  %v2719_v53 = vor.u32 %v2059_v42, %v1916_v45  ;;  %v2055_v55 = vld [vmem:[%s3194_s1 + $0xa4] sm:$0xf] }
  0x5d   : > { %542 = vmatpush.bf16.msra.mxu3 %v2613_v11  ;;  %v2722_v54 = vor.u32 %v2036_v46, %v1828_v47  ;;  %v1900_v56 = vld [vmem:[%s3194_s1 + $0xb0] sm:$0xf0]  ;;  %v2051_v60 = vld [vmem:[%s3194_s1 + $0x84] sm:$0xf]  ;;  %v336_v29 = vld [vmem:[%s2480_s28 + $0x18] sm:$0xff] }
  0x5e   : > { %504 = vmatpush.bf16.msra.mxu1 %v2597_v6  ;;  %765 = vmatpush.bf16.msra.mxu0 %v2597_v6  ;;  %v2734_v59 = vor.u32 %v2055_v55, %v1900_v56  ;;  %v1884_v62 = vld [vmem:[%s3194_s1 + $0x90] sm:$0xf0]  ;;  %v2047_v0 = vld [vmem:[%s3194_s1 + $0x64] sm:$0xf]  ;;  %v334_v40 = vld [vmem:[%s2480_s28 + $0x8] sm:$0xff] }
  0x5f   : > { %530 = vmatpush.bf16.msra.mxu2 %v2622_v14  ;;  %v2747_v63 = vor.u32 %v2051_v60, %v1884_v62  ;;  %v1868_v1 = vld [vmem:[%s3194_s1 + $0x70] sm:$0xf0]  ;;  %v2043_v4 = vld [vmem:[%s3194_s1 + $0x44] sm:$0xf] }
  0x60   : > { %v2759_v3 = vor.u32 %v2047_v0, %v1868_v1  ;;  %v1852_v7 = vld [vmem:[%s3194_s1 + $0x50] sm:$0xf0]  ;;  %v2039_v9 = vld [vmem:[%s3194_s1 + $0x24] sm:$0xf] }
  0x61   : > { %543 = vmatpush.bf16.msra.mxu3 %v2641_v20  ;;  %v2771_v8 = vor.u32 %v2043_v4, %v1852_v7  ;;  %v1836_v10 = vld [vmem:[%s3194_s1 + $0x30] sm:$0xf0]  ;;  %v2035_v13 = vld [vmem:[%s3194_s1 + $0x4] sm:$0xf] }
  0x62   : > { %505 = vmatpush.bf16.msra.mxu1 %v2625_v15  ;;  %766 = vmatpush.bf16.msra.mxu0 %v2625_v15  ;;  %v2783_v12 = vor.u32 %v2039_v9, %v1836_v10  ;;  %v1820_v16 = vld [vmem:[%s3194_s1 + $0x10] sm:$0xf0]  ;;  %v335_v4 = vld [vmem:[%s2480_s28 + $0x10] sm:$0xff] }
  0x63   : > { %531 = vmatpush.bf16.msra.mxu2 %v2650_v23  ;;  %v2795_v17 = vor.u32 %v2035_v13, %v1820_v16  ;;  %v333_v19 = vld [vmem:[%s2480_s28] sm:$0xff] }
  0x65   : > { %544 = vmatpush.bf16.msra.mxu3 %v2672_v30 }
  0x66   : > { %506 = vmatpush.bf16.msra.mxu1 %v2653_v24  ;;  %767 = vmatpush.bf16.msra.mxu0 %v2653_v24 }
  0x67   : > { %532 = vmatpush.bf16.msra.mxu2 %v2684_v34 }
  0x69   : > { %545 = vmatpush.bf16.msra.mxu3 %v2702_v44 }
  0x6a   : > { %507 = vmatpush.bf16.msra.mxu1 %v2687_v35  ;;  %768 = vmatpush.bf16.msra.mxu0 %v2687_v35 }
  0x6b   : > { %533 = vmatpush.bf16.msra.mxu2 %v2714_v52 }
  0x6d   : > { %508 = vmatmul.bf16.vlgmr.msra.gmra.mxu1 %v339_v50  ;;  %546 = vmatpush.bf16.msra.mxu3 %v2722_v54 }
  0x6e   : > { %513 = vmatpush.bf16.msrb.mxu1 %v2696_v41  ;;  %892 = vmatpush.bf16.msrb.mxu0 %v2494_v36 }
  0x6f   : > { %630 = vmatpush.bf16.msrb.mxu2 %v2494_v36 }
  0x70   : > { %534 = vmatmul.bf16.vlgmr.msra.gmra.mxu2 %v339_v50  ;;  %547 = vmatmul.bf16.vlgmr.msra.gmra.mxu3 %v339_v50 }
  0x71   : > { %669 = vmatpush.bf16.msrb.mxu3 %v2532_v49 }
  0x72   : > { %514 = vmatpush.bf16.msrb.mxu1 %v2719_v53  ;;  %893 = vmatpush.bf16.msrb.mxu0 %v2503_v39 }
  0x73   : > { %631 = vmatpush.bf16.msrb.mxu2 %v2503_v39 }
  0x75   : > { %670 = vmatpush.bf16.msrb.mxu3 %v2557_v57 }
  0x76   : > { %515 = vmatpush.bf16.msrb.mxu1 %v2734_v59  ;;  %894 = vmatpush.bf16.msrb.mxu0 %v2538_v51 }
  0x77   : > { %632 = vmatpush.bf16.msrb.mxu2 %v2538_v51 }
  0x79   : > { %671 = vmatpush.bf16.msrb.mxu3 %v2585_v2 }
  0x7a   : > { %516 = vmatpush.bf16.msrb.mxu1 %v2747_v63  ;;  %895 = vmatpush.bf16.msrb.mxu0 %v2569_v61 }
  0x7b   : > { %633 = vmatpush.bf16.msrb.mxu2 %v2569_v61 }
  0x7d   : > { %672 = vmatpush.bf16.msrb.mxu3 %v2613_v11 }
  0x7e   : > { %517 = vmatpush.bf16.msrb.mxu1 %v2759_v3  ;;  %896 = vmatpush.bf16.msrb.mxu0 %v2597_v6 }
  0x7f   : > { %634 = vmatpush.bf16.msrb.mxu2 %v2597_v6 }
  0x81   : > { %673 = vmatpush.bf16.msrb.mxu3 %v2641_v20 }
  0x82   : > { %518 = vmatpush.bf16.msrb.mxu1 %v2771_v8  ;;  %897 = vmatpush.bf16.msrb.mxu0 %v2625_v15 }
  0x83   : > { %635 = vmatpush.bf16.msrb.mxu2 %v2625_v15 }
  0x85   : > { %674 = vmatpush.bf16.msrb.mxu3 %v2672_v30 }
  0x86   : > { %519 = vmatpush.bf16.msrb.mxu1 %v2783_v12  ;;  %898 = vmatpush.bf16.msrb.mxu0 %v2653_v24 }
  0x87   : > { %636 = vmatpush.bf16.msrb.mxu2 %v2653_v24 }
  0x89   : > { %675 = vmatpush.bf16.msrb.mxu3 %v2702_v44 }
  0x8a   : > { %520 = vmatpush.bf16.msrb.mxu1 %v2795_v17  ;;  %899 = vmatpush.bf16.msrb.mxu0 %v2687_v35 }
  0x8b   : > { %637 = vmatpush.bf16.msrb.mxu2 %v2687_v35 }
  0x8d   : > { %521 = vmatmul.bf16.vlgmr.msrb.gmra.mxu1 %v339_v50  ;;  %676 = vmatpush.bf16.msrb.mxu3 %v2722_v54 }
  0x8e   : > { %643 = vmatpush.bf16.msra.mxu1 %v2696_v41 }
  0x8f   : > { %656 = vmatpush.bf16.msra.mxu2 %v2515_v43 }
  0x91   : > { %800 = vmatpush.bf16.msra.mxu3 %v2532_v49 }
  0x92   : > { %644 = vmatpush.bf16.msra.mxu1 %v2719_v53 }
  0x93   : > { %657 = vmatpush.bf16.msra.mxu2 %v2530_v48 }
  0x95   : > { %801 = vmatpush.bf16.msra.mxu3 %v2557_v57 }
  0x96   : > { %645 = vmatpush.bf16.msra.mxu1 %v2734_v59 }
  0x97   : > { %658 = vmatpush.bf16.msra.mxu2 %v2560_v58 }
  0x99   : > { %802 = vmatpush.bf16.msra.mxu3 %v2585_v2 }
  0x9a   : > { %646 = vmatpush.bf16.msra.mxu1 %v2747_v63 }
  0x9b   : > { %659 = vmatpush.bf16.msra.mxu2 %v2594_v5 }
  0x9d   : > { %803 = vmatpush.bf16.msra.mxu3 %v2613_v11 }
  0x9e   : > { %647 = vmatpush.bf16.msra.mxu1 %v2759_v3 }
  0x9f   : > { %660 = vmatpush.bf16.msra.mxu2 %v2622_v14 }
  0xa1   : > { %804 = vmatpush.bf16.msra.mxu3 %v2641_v20 }
  0xa2   : > { %648 = vmatpush.bf16.msra.mxu1 %v2771_v8 }
  0xa3   : > { %661 = vmatpush.bf16.msra.mxu2 %v2650_v23 }
  0xa5   : > { %805 = vmatpush.bf16.msra.mxu3 %v2672_v30 }
  0xa6   : > { %649 = vmatpush.bf16.msra.mxu1 %v2783_v12 }
  0xa7   : > { %662 = vmatpush.bf16.msra.mxu2 %v2684_v34 }
  0xa9   : > { %806 = vmatpush.bf16.msra.mxu3 %v2702_v44 }
  0xaa   : > { %650 = vmatpush.bf16.msra.mxu1 %v2795_v17 }
  0xab   : > { %663 = vmatpush.bf16.msra.mxu2 %v2714_v52 }
  0xad   : > { %807 = vmatpush.bf16.msra.mxu3 %v2722_v54 }
  0xae   : > { %774 = vmatpush.bf16.msrb.mxu1 %v2696_v41 }
  0xb2   : > { %775 = vmatpush.bf16.msrb.mxu1 %v2719_v53 }
  0xb6   : > { %776 = vmatpush.bf16.msrb.mxu1 %v2734_v59 }
  0xba   : > { %777 = vmatpush.bf16.msrb.mxu1 %v2747_v63 }
  0xbe   : > { %778 = vmatpush.bf16.msrb.mxu1 %v2759_v3 }
  0xc2   : > { %779 = vmatpush.bf16.msrb.mxu1 %v2771_v8 }
  0xc6   : > { %780 = vmatpush.bf16.msrb.mxu1 %v2783_v12 }
  0xca   : > { %781 = vmatpush.bf16.msrb.mxu1 %v2795_v17 }
  0xea   : > { %v509_v18 = vpop.f32.mrf.mxu1 }
  0xeb   : > { %v552_v21 = vadd.f32 %v509_v18, %v333_v19 }
  0xed   : > { %v1944_v26 = vmul.f32 -1.442695, %v552_v21 }
  0xef   : > { %2134 = vpow2.f32 %v1944_v26 }
  0xf2   : > { %v511_v22 = vpop.f32.mrf.mxu1 }
  0xf3   : > { %v535_v25 = vpop.f32.mrf.mxu2  ;;  %v548_v27 = vpop.f32.mrf.mxu3 }
  0xf4   : > { %v555_v33 = vadd.f32 %v548_v27, %v336_v29  ;;  %v554_v9 = vadd.f32 %v535_v25, %v335_v4 }
  0xf5   : > { %v2135_v32 = vpop.eup %2134 }
  0xf6   : > { %v559_v37 = vadd.f32 1.0, %v2135_v32  ;;  %v1946_v38 = vmul.f32 -1.442695, %v555_v33 }
  0xf8   : > { %2136 = vrcp.f32 %v559_v37  ;;  %vm565_vm0 = vweird.f32 %v559_v37  ;;  %v569_v16 = vand.u32 2147483647, %v559_v37  ;;  %v571_v18 = vand.u32 2147483648, %v559_v37 }
  0xf9   : > { %2138 = vpow2.f32 %v1946_v38 }
  0xfa   : > { %vm570_vm3 = vcmp.eq.f32.partialorder %v569_v16, 8.507059e+37 }
  0xfb   : > { %v537_v28 = vpop.f32.mrf.mxu2  ;;  %v550_v31 = vpop.f32.mrf.mxu3 }
  0xfc   : > { %v572_v28 = vor.u32 1.1754944e-38, %v571_v18 }
  0xfe   : > { %v2137_v47 = vpop.eup %2136 }
  0xff   : > { %v2139_v50 = vpop.eup %2138  ;;  %v561_v56 = vmul.f32 %v2137_v47, %v559_v37  ;;  %vm566_vm1 = vweird.f32 %v2137_v47 }
 0x100   : > { %v598_v60 = vadd.f32 1.0, %v2139_v50  ;;  %vm2841_vm2 = vmor %vm565_vm0, %vm566_vm1 }
 0x101   : > { %v562_v1 = vsub.f32 1.0, %v561_v56 }
 0x102   : > { %vm604_vm8 = vweird.f32 %v598_v60 }
 0x103   : > { %v563_v7 = vmul.f32 %v2137_v47, %v562_v1 }
 0x105   : > { %v564_v19 = vadd.f32 %v2137_v47, %v563_v7  ;;  %v608_v7 = vand.u32 2147483647, %v598_v60 }
 0x107   : > { %v568_v25 = vsel %vm2841_vm2, %v2137_v47, %v564_v19  ;;  %v610_v47 = vand.u32 2147483648, %v598_v60  ;;  %vm609_vm11 = vcmp.eq.f32.partialorder %v608_v7, 8.507059e+37 }
 0x10a   : > { %v522_v42 = vpop.f32.mrf.mxu1 }
 0x10b   : > { %v553_v45 = vadd.f32 %v522_v42, %v334_v40  ;;  %v573_v40 = vsel %vm570_vm3, %v572_v28, %v568_v25  ;;  %v338_v42 = vld [vmem:[#allocation3] sm:$0xff] }
 0x10d   : > { %v1945_v46 = vmul.f32 -1.442695, %v553_v45 }
 0x10f   : > { %2140 = vpow2.f32 %v1945_v46 }
 0x110   : > { %2142 = vrcp.f32 %v598_v60 }
 0x112   : > { %v524_v55 = vpop.f32.mrf.mxu1 }
 0x115   : > { %v2141_v62 = vpop.eup %2140 }
 0x116   : > { %v578_v0 = vadd.f32 1.0, %v2141_v62  ;;  %v2143_v10 = vpop.eup %2142 }
 0x117   : > { %v600_v26 = vmul.f32 %v2143_v10, %v598_v60  ;;  %vm605_vm9 = vweird.f32 %v2143_v10  ;;  %v1948_v60 = vld [vmem:[%s2480_s28 + $0x28] sm:$0xff] }
 0x118   : > { %2144 = vrcp.f32 %v578_v0  ;;  %v590_v29 = vand.u32 2147483648, %v578_v0  ;;  %v588_v32 = vand.u32 2147483647, %v578_v0  ;;  %vm584_vm5 = vweird.f32 %v578_v0  ;;  %vm606_vm10 = vmor %vm604_vm8, %vm605_vm9 }
 0x119   : > { %2146 = vtanh.f32 %v554_v9  ;;  %v601_v33 = vsub.f32 1.0, %v600_v26  ;;  %v1947_v26 = vld [vmem:[%s2480_s28 + $0x20] sm:$0xff] }
 0x11a   : > { %v591_v45 = vor.u32 1.1754944e-38, %v590_v29  ;;  %vm589_vm7 = vcmp.eq.f32.partialorder %v588_v32, 8.507059e+37 }
 0x11b   : > { %v602_v50 = vmul.f32 %v2143_v10, %v601_v33 }
 0x11d   : > { %v603_v4 = vadd.f32 %v2143_v10, %v602_v50 }
 0x11e   : > { %v2145_v13 = vpop.eup %2144 }
 0x11f   : > { %v580_v21 = vmul.f32 %v2145_v13, %v578_v0  ;;  %vm585_vm4 = vweird.f32 %v2145_v13  ;;  %v2147_v38 = vpop.eup %2146  ;;  %v611_v0 = vor.u32 1.1754944e-38, %v610_v47  ;;  %v607_v9 = vsel %vm606_vm10, %v2143_v10, %v603_v4 }
 0x120   : > { %vm586_vm6 = vmor %vm584_vm5, %vm585_vm4  ;;  %v615_v56 = vmul.f32 %v2147_v38, %v573_v40 }
 0x121   : > { %v581_v27 = vsub.f32 1.0, %v580_v21 }
 0x123   : > { %v582_v31 = vmul.f32 %v2145_v13, %v581_v27  ;;  %v1950_v27 = vld [vmem:[%s2480_s28 + $0x38] sm:$0xff] }
 0x125   : > { %v583_v37 = vadd.f32 %v2145_v13, %v582_v31 }
 0x127   : > { %v587_v46 = vsel %vm586_vm6, %v2145_v13, %v583_v37  ;;  %v612_v13 = vsel %vm609_vm11, %v611_v0, %v607_v9  ;;  %v1949_v0 = vld [vmem:[%s2480_s28 + $0x30] sm:$0xff] }
 0x128   : > { %v592_v55 = vsel %vm589_vm7, %v591_v45, %v587_v46 }
 0x129   : > { %v614_v62 = vmul.f32 %v592_v55, %v338_v42 }
 0x12b   : > { %v2847_v1 = vadd.f32 %v615_v56, %v614_v62 }
 0x12d   : > { %2148 = vtanh.f32 %v2847_v1 }
 0x133   : > { %v2149_v16 = vpop.eup %2148 }
 0x134   : > { %v2850_v18 = vmul.f32 %v2149_v16, %v612_v13 }
 0x136   : > { %v629_v19 = vpack.c.bf16 %v2850_v18, %v2850_v18 }
 0x138   : > { %638 = vmatmul.bf16.vlgmr.msrb.gmra.mxu2 %v629_v19  ;;  %651 = vmatmul.bf16.vlgmr.msra.gmra.mxu1 %v629_v19 }
 0x139   : > { %677 = vmatmul.bf16.vlgmr.msrb.gmra.mxu3 %v629_v19  ;;  %787 = vmatpush.bf16.msrb.mxu2 %v2515_v43 }
 0x13a   : > { %905 = vmatpush.bf16.msra.mxu1 %v2696_v41  ;;  %931 = vmatpush.bf16.msrb.mxu3 %v2532_v49 }
 0x13d   : > { %788 = vmatpush.bf16.msrb.mxu2 %v2530_v48 }
 0x13e   : > { %906 = vmatpush.bf16.msra.mxu1 %v2719_v53  ;;  %932 = vmatpush.bf16.msrb.mxu3 %v2557_v57 }
 0x141   : > { %789 = vmatpush.bf16.msrb.mxu2 %v2560_v58 }
 0x142   : > { %907 = vmatpush.bf16.msra.mxu1 %v2734_v59  ;;  %933 = vmatpush.bf16.msrb.mxu3 %v2585_v2 }
 0x145   : > { %790 = vmatpush.bf16.msrb.mxu2 %v2594_v5 }
 0x146   : > { %908 = vmatpush.bf16.msra.mxu1 %v2747_v63  ;;  %934 = vmatpush.bf16.msrb.mxu3 %v2613_v11 }
 0x148   : > { %664 = vmatmul.bf16.vlgmr.msra.gmra.mxu2 %v629_v19 }
 0x149   : > { %791 = vmatpush.bf16.msrb.mxu2 %v2622_v14 }
 0x14a   : > { %909 = vmatpush.bf16.msra.mxu1 %v2759_v3  ;;  %935 = vmatpush.bf16.msrb.mxu3 %v2641_v20 }
 0x14d   : > { %792 = vmatpush.bf16.msrb.mxu2 %v2650_v23 }
 0x14e   : > { %910 = vmatpush.bf16.msra.mxu1 %v2771_v8  ;;  %936 = vmatpush.bf16.msrb.mxu3 %v2672_v30 }
 0x151   : > { %793 = vmatpush.bf16.msrb.mxu2 %v2684_v34 }
 0x152   : > { %911 = vmatpush.bf16.msra.mxu1 %v2783_v12  ;;  %937 = vmatpush.bf16.msrb.mxu3 %v2702_v44 }
 0x155   : > { %794 = vmatpush.bf16.msrb.mxu2 %v2714_v52 }
 0x156   : > { %912 = vmatpush.bf16.msra.mxu1 %v2795_v17  ;;  %938 = vmatpush.bf16.msrb.mxu3 %v2722_v54 }
 0x159   : > { %918 = vmatpush.bf16.msra.mxu2 %v2515_v43 }
 0x15d   : > { %919 = vmatpush.bf16.msra.mxu2 %v2530_v48 }
 0x161   : > { %920 = vmatpush.bf16.msra.mxu2 %v2560_v58 }
 0x165   : > { %921 = vmatpush.bf16.msra.mxu2 %v2594_v5 }
 0x169   : > { %922 = vmatpush.bf16.msra.mxu2 %v2622_v14 }
 0x16d   : > { %923 = vmatpush.bf16.msra.mxu2 %v2650_v23 }
 0x171   : > { %924 = vmatpush.bf16.msra.mxu2 %v2684_v34 }
 0x175   : > { %925 = vmatpush.bf16.msra.mxu2 %v2714_v52 }
 0x1b5   : > { %v652_v10 = vpop.f32.mrf.mxu1 }
 0x1b6   : > { %v683_v21 = vadd.f32 %v1948_v60, %v652_v10 }
 0x1b8   : > { %v1952_v22 = vmul.f32 -1.442695, %v683_v21 }
 0x1ba   : > { %2150 = vpow2.f32 %v1952_v22 }
 0x1bb   : > { %v639_v28 = vpop.f32.mrf.mxu2 }
 0x1bc   : > { %v682_v29 = vadd.f32 %v1947_v26, %v639_v28  ;;  %v678_v25 = vpop.f32.mrf.mxu3 }
 0x1bd   : > { %v685_v31 = vadd.f32 %v1950_v27, %v678_v25  ;;  %v654_v32 = vpop.f32.mrf.mxu1 }
 0x1be   : > { %v1951_v33 = vmul.f32 -1.442695, %v682_v29 }
 0x1bf   : > { %v1953_v37 = vmul.f32 -1.442695, %v685_v31 }
 0x1c0   : > { %v2151_v38 = vpop.eup %2150  ;;  %2152 = vpow2.f32 %v1951_v33 }
 0x1c1   : > { %v708_v40 = vadd.f32 1.0, %v2151_v38  ;;  %2154 = vpow2.f32 %v1953_v37 }
 0x1c3   : > { %2156 = vrcp.f32 %v708_v40  ;;  %v641_v42 = vpop.f32.mrf.mxu2  ;;  %v720_v21 = vand.u32 2147483648, %v708_v40  ;;  %vm714_vm13 = vweird.f32 %v708_v40  ;;  %v718_v27 = vand.u32 2147483647, %v708_v40 }
 0x1c4   : > { %v680_v45 = vpop.f32.mrf.mxu3 }
 0x1c5   : > { %v721_v37 = vor.u32 1.1754944e-38, %v720_v21  ;;  %vm719_vm1 = vcmp.eq.f32.partialorder %v718_v27, 8.507059e+37 }
 0x1c6   : > { %v2153_v46 = vpop.eup %2152 }
 0x1c7   : > { %v2155_v50 = vpop.eup %2154  ;;  %v689_v55 = vadd.f32 1.0, %v2153_v46 }
 0x1c8   : > { %v728_v56 = vadd.f32 1.0, %v2155_v50 }
 0x1c9   : > { %v2157_v62 = vpop.eup %2156  ;;  %2158 = vrcp.f32 %v689_v55  ;;  %v701_v29 = vand.u32 2147483648, %v689_v55  ;;  %v699_v32 = vand.u32 2147483647, %v689_v55  ;;  %vm695_vm0 = vweird.f32 %v689_v55 }
 0x1ca   : > { %v710_v47 = vmul.f32 %v2157_v62, %v708_v40  ;;  %2160 = vrcp.f32 %v728_v56  ;;  %vm715_vm12 = vweird.f32 %v2157_v62  ;;  %vm734_vm5 = vweird.f32 %v728_v56 }
 0x1cb   : > { %v665_v4 = vpop.f32.mrf.mxu2  ;;  %vm2890_vm14 = vmor %vm714_vm13, %vm715_vm12  ;;  %v702_v40 = vor.u32 1.1754944e-38, %v701_v29  ;;  %vm700_vm3 = vcmp.eq.f32.partialorder %v699_v32, 8.507059e+37  ;;  %v1957_v32 = vld [vmem:[%s2480_s28 + $0x58] sm:$0xff] }
 0x1cc   : > { %v711_v7 = vsub.f32 1.0, %v710_v47  ;;  %v684_v13 = vadd.f32 %v1949_v0, %v665_v4 }
 0x1ce   : > { %v712_v9 = vmul.f32 %v2157_v62, %v711_v7  ;;  %2162 = vtanh.f32 %v684_v13 }
 0x1cf   : > { %v2159_v16 = vpop.eup %2158 }
 0x1d0   : > { %v2161_v19 = vpop.eup %2160  ;;  %v691_v60 = vmul.f32 %v2159_v16, %v689_v55  ;;  %v713_v10 = vadd.f32 %v2157_v62, %v712_v9  ;;  %vm696_vm15 = vweird.f32 %v2159_v16  ;;  %v738_v55 = vand.u32 2147483647, %v728_v56 }
 0x1d1   : > { %v730_v22 = vmul.f32 %v2161_v19, %v728_v56  ;;  %vm697_vm2 = vmor %vm695_vm0, %vm696_vm15  ;;  %vm735_vm4 = vweird.f32 %v2161_v19 }
 0x1d2   : > { %v692_v26 = vsub.f32 1.0, %v691_v60  ;;  %v717_v33 = vsel %vm2890_vm14, %v2157_v62, %v713_v10  ;;  %v740_v62 = vand.u32 2147483648, %v728_v56  ;;  %vm736_vm6 = vmor %vm734_vm5, %vm735_vm4  ;;  %vm739_vm7 = vcmp.eq.f32.partialorder %v738_v55, 8.507059e+37  ;;  %v1954_v56 = vld [vmem:[%s2480_s28 + $0x40] sm:$0xff] }
 0x1d3   : > { %v667_v25 = vpop.f32.mrf.mxu2  ;;  %v731_v38 = vsub.f32 1.0, %v730_v22  ;;  %v722_v45 = vsel %vm719_vm1, %v721_v37, %v717_v33 }
 0x1d4   : > { %v693_v31 = vmul.f32 %v2159_v16, %v692_v26  ;;  %v2163_v50 = vpop.eup %2162  ;;  %v744_v7 = vmul.f32 %v722_v45, %v2847_v1  ;;  %v741_v10 = vor.u32 1.1754944e-38, %v740_v62 }
 0x1d5   : > { %v732_v47 = vmul.f32 %v2161_v19, %v731_v38 }
 0x1d6   : > { %v694_v42 = vadd.f32 %v2159_v16, %v693_v31 }
 0x1d7   : > { %v733_v13 = vadd.f32 %v2161_v19, %v732_v47 }
 0x1d8   : > { %v698_v46 = vsel %vm697_vm2, %v2159_v16, %v694_v42 }
 0x1d9   : > { %v703_v4 = vsel %vm700_vm3, %v702_v40, %v698_v46  ;;  %v737_v60 = vsel %vm736_vm6, %v2161_v19, %v733_v13  ;;  %v1955_v19 = vld [vmem:[%s2480_s28 + $0x48] sm:$0xff]  ;;  %v1956_v13 = vld [vmem:[%s2480_s28 + $0x50] sm:$0xff] }
 0x1da   : > { %v745_v0 = vmul.f32 %v2163_v50, %v703_v4  ;;  %v742_v21 = vsel %vm739_vm7, %v741_v10, %v737_v60 }
 0x1dc   : > { %v2897_v9 = vadd.f32 %v745_v0, %v744_v7 }
 0x1de   : > { %2164 = vtanh.f32 %v2897_v9 }
 0x1e4   : > { %v2165_v16 = vpop.eup %2164 }
 0x1e5   : > { %v2900_v22 = vmul.f32 %v2165_v16, %v742_v21 }
 0x1e7   : > { %v760_v1 = vpack.c.bf16 %v2900_v22, %v2900_v22 }
 0x1e9   : > { %769 = vmatmul.bf16.vlgmr.msra.gmra.mxu0 %v760_v1  ;;  %782 = vmatmul.bf16.vlgmr.msrb.gmra.mxu1 %v760_v1 }
 0x1ea   : > { %795 = vmatmul.bf16.vlgmr.msrb.gmra.mxu2 %v760_v1  ;;  %808 = vmatmul.bf16.vlgmr.msra.gmra.mxu3 %v760_v1 }
 0x1eb   : > { %1023 = vmatpush.bf16.msra.mxu0 %v2494_v36  ;;  %1036 = vmatpush.bf16.msrb.mxu1 %v2696_v41 }
 0x1ec   : > { %1049 = vmatpush.bf16.msrb.mxu2 %v2515_v43  ;;  %1062 = vmatpush.bf16.msra.mxu3 %v2532_v49 }
 0x1ef   : > { %1024 = vmatpush.bf16.msra.mxu0 %v2503_v39  ;;  %1037 = vmatpush.bf16.msrb.mxu1 %v2719_v53 }
 0x1f0   : > { %1050 = vmatpush.bf16.msrb.mxu2 %v2530_v48  ;;  %1063 = vmatpush.bf16.msra.mxu3 %v2557_v57 }
 0x1f3   : > { %1025 = vmatpush.bf16.msra.mxu0 %v2538_v51  ;;  %1038 = vmatpush.bf16.msrb.mxu1 %v2734_v59 }
 0x1f4   : > { %1051 = vmatpush.bf16.msrb.mxu2 %v2560_v58  ;;  %1064 = vmatpush.bf16.msra.mxu3 %v2585_v2 }
 0x1f7   : > { %1026 = vmatpush.bf16.msra.mxu0 %v2569_v61  ;;  %1039 = vmatpush.bf16.msrb.mxu1 %v2747_v63 }
 0x1f8   : > { %1052 = vmatpush.bf16.msrb.mxu2 %v2594_v5  ;;  %1065 = vmatpush.bf16.msra.mxu3 %v2613_v11 }
 0x1fb   : > { %1027 = vmatpush.bf16.msra.mxu0 %v2597_v6  ;;  %1040 = vmatpush.bf16.msrb.mxu1 %v2759_v3 }
 0x1fc   : > { %1053 = vmatpush.bf16.msrb.mxu2 %v2622_v14  ;;  %1066 = vmatpush.bf16.msra.mxu3 %v2641_v20 }
 0x1ff   : > { %1028 = vmatpush.bf16.msra.mxu0 %v2625_v15  ;;  %1041 = vmatpush.bf16.msrb.mxu1 %v2771_v8 }
 0x200   : > { %1054 = vmatpush.bf16.msrb.mxu2 %v2650_v23  ;;  %1067 = vmatpush.bf16.msra.mxu3 %v2672_v30 }
 0x203   : > { %1029 = vmatpush.bf16.msra.mxu0 %v2653_v24  ;;  %1042 = vmatpush.bf16.msrb.mxu1 %v2783_v12 }
 0x204   : > { %1055 = vmatpush.bf16.msrb.mxu2 %v2684_v34  ;;  %1068 = vmatpush.bf16.msra.mxu3 %v2702_v44 }
 0x207   : > { %1030 = vmatpush.bf16.msra.mxu0 %v2687_v35  ;;  %1043 = vmatpush.bf16.msrb.mxu1 %v2795_v17 }
 0x208   : > { %1056 = vmatpush.bf16.msrb.mxu2 %v2714_v52  ;;  %1069 = vmatpush.bf16.msra.mxu3 %v2722_v54 }
 0x266   : > { %v770_v26 = vpop.f32.mrf.mxu0  ;;  %v783_v27 = vpop.f32.mrf.mxu1 }
 0x267   : > { %v813_v28 = vadd.f32 %v1954_v56, %v770_v26  ;;  %v814_v29 = vadd.f32 %v1955_v19, %v783_v27 }
 0x269   : > { %v1958_v25 = vmul.f32 -1.442695, %v813_v28  ;;  %v1959_v31 = vmul.f32 -1.442695, %v814_v29 }
 0x26b   : > { %2166 = vpow2.f32 %v1958_v25 }
 0x26c   : > { %2168 = vpow2.f32 %v1959_v31 }
 0x26d   : > { %v796_v33 = vpop.f32.mrf.mxu2  ;;  %v809_v37 = vpop.f32.mrf.mxu3 }
 0x26e   : > { %v816_v38 = vadd.f32 %v1957_v32, %v809_v37  ;;  %v772_v42 = vpop.f32.mrf.mxu0  ;;  %v785_v40 = vpop.f32.mrf.mxu1  ;;  %v815_v10 = vadd.f32 %v1956_v13, %v796_v33 }
 0x270   : > { %v1960_v45 = vmul.f32 -1.442695, %v816_v38 }
 0x271   : > { %v2167_v46 = vpop.eup %2166 }
 0x272   : > { %v2169_v50 = vpop.eup %2168  ;;  %v820_v47 = vadd.f32 1.0, %v2167_v46  ;;  %2170 = vpow2.f32 %v1960_v45 }
 0x273   : > { %v839_v4 = vadd.f32 1.0, %v2169_v50 }
 0x274   : > { %2172 = vrcp.f32 %v820_v47  ;;  %v832_v26 = vand.u32 2147483648, %v820_v47  ;;  %v830_v29 = vand.u32 2147483647, %v820_v47  ;;  %vm826_vm10 = vweird.f32 %v820_v47 }
 0x275   : > { %2174 = vrcp.f32 %v839_v4  ;;  %v798_v7 = vpop.f32.mrf.mxu2  ;;  %v811_v0 = vpop.f32.mrf.mxu3  ;;  %v851_v27 = vand.u32 2147483648, %v839_v4  ;;  %v849_v31 = vand.u32 2147483647, %v839_v4  ;;  %vm845_vm11 = vweird.f32 %v839_v4 }
 0x276   : > { %v833_v33 = vor.u32 1.1754944e-38, %v832_v26  ;;  %vm831_vm14 = vcmp.eq.f32.partialorder %v830_v29, 8.507059e+37 }
 0x277   : > { %v852_v40 = vor.u32 1.1754944e-38, %v851_v27  ;;  %vm850_vm15 = vcmp.eq.f32.partialorder %v849_v31, 8.507059e+37 }
 0x278   : > { %v2171_v62 = vpop.eup %2170 }
 0x279   : > { %v859_v55 = vadd.f32 1.0, %v2171_v62 }
 0x27a   : > { %v2173_v60 = vpop.eup %2172 }
 0x27b   : > { %v2175_v16 = vpop.eup %2174  ;;  %v822_v21 = vmul.f32 %v2173_v60, %v820_v47  ;;  %2176 = vrcp.f32 %v859_v55  ;;  %vm827_vm8 = vweird.f32 %v2173_v60  ;;  %vm865_vm1 = vweird.f32 %v859_v55 }
 0x27c   : > { %v841_v1 = vmul.f32 %v2175_v16, %v839_v4  ;;  %2178 = vtanh.f32 %v815_v10  ;;  %vm846_vm9 = vweird.f32 %v2175_v16  ;;  %vm828_vm12 = vmor %vm826_vm10, %vm827_vm8 }
 0x27d   : > { %v823_v56 = vsub.f32 1.0, %v822_v21  ;;  %vm847_vm13 = vmor %vm845_vm11, %vm846_vm9 }
 0x27e   : > { %v842_v19 = vsub.f32 1.0, %v841_v1  ;;  %v871_v1 = vand.u32 2147483648, %v859_v55 }
 0x27f   : > { %v824_v28 = vmul.f32 %v2173_v60, %v823_v56 }
 0x280   : > { %v843_v25 = vmul.f32 %v2175_v16, %v842_v19  ;;  %v872_v19 = vor.u32 1.1754944e-38, %v871_v1  ;;  %v1963_v1 = vld [vmem:[%s2480_s28 + $0x70] sm:$0xff] }
 0x281   : > { %v2177_v32 = vpop.eup %2176  ;;  %v825_v37 = vadd.f32 %v2173_v60, %v824_v28  ;;  %v1962_v28 = vld [vmem:[%s2480_s28 + $0x68] sm:$0xff] }
 0x282   : > { %v844_v38 = vadd.f32 %v2175_v16, %v843_v25  ;;  %v861_v42 = vmul.f32 %v2177_v32, %v859_v55  ;;  %v2179_v46 = vpop.eup %2178  ;;  %vm866_vm0 = vweird.f32 %v2177_v32 }
 0x283   : > { %v829_v45 = vsel %vm828_vm12, %v2173_v60, %v825_v37  ;;  %v869_v60 = vand.u32 2147483647, %v859_v55  ;;  %vm867_vm2 = vmor %vm865_vm1, %vm866_vm0  ;;  %v1961_v55 = vld [vmem:[%s2480_s28 + $0x60] sm:$0xff] }
 0x284   : > { %v834_v50 = vsel %vm831_vm14, %v833_v33, %v829_v45  ;;  %v848_v7 = vsel %vm847_vm13, %v2175_v16, %v844_v38  ;;  %v862_v0 = vsub.f32 1.0, %v861_v42  ;;  %v1964_v38 = vld [vmem:[%s2480_s28 + $0x78] sm:$0xff] }
 0x285   : > { %v853_v13 = vsel %vm850_vm15, %v852_v40, %v848_v7  ;;  %v876_v62 = vmul.f32 %v2179_v46, %v834_v50  ;;  %vm870_vm3 = vcmp.eq.f32.partialorder %v869_v60, 8.507059e+37 }
 0x286   : > { %v875_v10 = vmul.f32 %v853_v13, %v2897_v9  ;;  %v863_v21 = vmul.f32 %v2177_v32, %v862_v0 }
 0x288   : > { %v2941_v47 = vadd.f32 %v876_v62, %v875_v10  ;;  %v864_v4 = vadd.f32 %v2177_v32, %v863_v21 }
 0x28a   : > { %2180 = vtanh.f32 %v2941_v47  ;;  %v868_v56 = vsel %vm867_vm2, %v2177_v32, %v864_v4 }
 0x28b   : > { %v873_v26 = vsel %vm870_vm3, %v872_v19, %v868_v56 }
 0x290   : > { %v2181_v16 = vpop.eup %2180 }
 0x291   : > { %v2944_v27 = vmul.f32 %v2181_v16, %v873_v26 }
 0x293   : > { %v891_v9 = vpack.c.bf16 %v2944_v27, %v2944_v27 }
 0x295   : > { %900 = vmatmul.bf16.vlgmr.msrb.gmra.mxu0 %v891_v9  ;;  %913 = vmatmul.bf16.vlgmr.msra.gmra.mxu1 %v891_v9 }
 0x296   : > { %926 = vmatmul.bf16.vlgmr.msra.gmra.mxu2 %v891_v9  ;;  %939 = vmatmul.bf16.vlgmr.msrb.gmra.mxu3 %v891_v9 }
 0x297   : > { %1154 = vmatpush.bf16.msrb.mxu0 %v2494_v36  ;;  %1167 = vmatpush.bf16.msra.mxu1 %v2696_v41 }
 0x298   : > { %1180 = vmatpush.bf16.msra.mxu2 %v2515_v43  ;;  %1193 = vmatpush.bf16.msrb.mxu3 %v2532_v49 }
 0x29b   : > { %1155 = vmatpush.bf16.msrb.mxu0 %v2503_v39  ;;  %1168 = vmatpush.bf16.msra.mxu1 %v2719_v53 }
 0x29c   : > { %1181 = vmatpush.bf16.msra.mxu2 %v2530_v48  ;;  %1194 = vmatpush.bf16.msrb.mxu3 %v2557_v57 }
 0x29f   : > { %1156 = vmatpush.bf16.msrb.mxu0 %v2538_v51  ;;  %1169 = vmatpush.bf16.msra.mxu1 %v2734_v59 }
 0x2a0   : > { %1182 = vmatpush.bf16.msra.mxu2 %v2560_v58  ;;  %1195 = vmatpush.bf16.msrb.mxu3 %v2585_v2 }
 0x2a3   : > { %1157 = vmatpush.bf16.msrb.mxu0 %v2569_v61  ;;  %1170 = vmatpush.bf16.msra.mxu1 %v2747_v63 }
 0x2a4   : > { %1183 = vmatpush.bf16.msra.mxu2 %v2594_v5  ;;  %1196 = vmatpush.bf16.msrb.mxu3 %v2613_v11 }
 0x2a7   : > { %1158 = vmatpush.bf16.msrb.mxu0 %v2597_v6  ;;  %1171 = vmatpush.bf16.msra.mxu1 %v2759_v3 }
 0x2a8   : > { %1184 = vmatpush.bf16.msra.mxu2 %v2622_v14  ;;  %1197 = vmatpush.bf16.msrb.mxu3 %v2641_v20 }
 0x2ab   : > { %1159 = vmatpush.bf16.msrb.mxu0 %v2625_v15  ;;  %1172 = vmatpush.bf16.msra.mxu1 %v2771_v8 }
 0x2ac   : > { %1185 = vmatpush.bf16.msra.mxu2 %v2650_v23  ;;  %1198 = vmatpush.bf16.msrb.mxu3 %v2672_v30 }
 0x2af   : > { %1160 = vmatpush.bf16.msrb.mxu0 %v2653_v24  ;;  %1173 = vmatpush.bf16.msra.mxu1 %v2783_v12 }
 0x2b0   : > { %1186 = vmatpush.bf16.msra.mxu2 %v2684_v34  ;;  %1199 = vmatpush.bf16.msrb.mxu3 %v2702_v44 }
 0x2b3   : > { %1161 = vmatpush.bf16.msrb.mxu0 %v2687_v35  ;;  %1174 = vmatpush.bf16.msra.mxu1 %v2795_v17 }
 0x2b4   : > { %1187 = vmatpush.bf16.msra.mxu2 %v2714_v52  ;;  %1200 = vmatpush.bf16.msrb.mxu3 %v2722_v54 }
 0x312   : > { %v901_v29 = vpop.f32.mrf.mxu0  ;;  %v914_v25 = vpop.f32.mrf.mxu1 }
 0x313   : > { %v944_v31 = vadd.f32 %v1961_v55, %v901_v29  ;;  %v945_v32 = vadd.f32 %v1962_v28, %v914_v25 }
 0x315   : > { %v1965_v37 = vmul.f32 -1.442695, %v944_v31  ;;  %v1966_v33 = vmul.f32 -1.442695, %v945_v32 }
 0x317   : > { %2182 = vpow2.f32 %v1965_v37 }
 0x318   : > { %2184 = vpow2.f32 %v1966_v33 }
 0x319   : > { %v927_v42 = vpop.f32.mrf.mxu2  ;;  %v940_v40 = vpop.f32.mrf.mxu3 }
 0x31a   : > { %v947_v45 = vadd.f32 %v1964_v38, %v940_v40  ;;  %v903_v46 = vpop.f32.mrf.mxu0  ;;  %v916_v50 = vpop.f32.mrf.mxu1  ;;  %v946_v16 = vadd.f32 %v1963_v1, %v927_v42 }
 0x31c   : > { %v1967_v7 = vmul.f32 -1.442695, %v947_v45 }
 0x31d   : > { %v2183_v0 = vpop.eup %2182 }
 0x31e   : > { %v2185_v13 = vpop.eup %2184  ;;  %v951_v62 = vadd.f32 1.0, %v2183_v0  ;;  %2186 = vpow2.f32 %v1967_v7 }
 0x31f   : > { %v970_v10 = vadd.f32 1.0, %v2185_v13 }
 0x320   : > { %2188 = vrcp.f32 %v951_v62  ;;  %v963_v25 = vand.u32 2147483648, %v951_v62  ;;  %v961_v37 = vand.u32 2147483647, %v951_v62  ;;  %vm957_vm6 = vweird.f32 %v951_v62 }
 0x321   : > { %2190 = vrcp.f32 %v970_v10  ;;  %v929_v21 = vpop.f32.mrf.mxu2  ;;  %v942_v4 = vpop.f32.mrf.mxu3  ;;  %v982_v31 = vand.u32 2147483648, %v970_v10  ;;  %v980_v38 = vand.u32 2147483647, %v970_v10  ;;  %vm976_vm7 = vweird.f32 %v970_v10 }
 0x322   : > { %v964_v42 = vor.u32 1.1754944e-38, %v963_v25  ;;  %vm962_vm10 = vcmp.eq.f32.partialorder %v961_v37, 8.507059e+37  ;;  %v1969_v37 = vld [vmem:[%s2480_s28 + $0x88] sm:$0xff] }
 0x323   : > { %v983_v7 = vor.u32 1.1754944e-38, %v982_v31  ;;  %vm981_vm11 = vcmp.eq.f32.partialorder %v980_v38, 8.507059e+37 }
 0x324   : > { %v2187_v60 = vpop.eup %2186 }
 0x325   : > { %v990_v56 = vadd.f32 1.0, %v2187_v60 }
 0x326   : > { %v2189_v19 = vpop.eup %2188 }
 0x327   : > { %v2191_v26 = vpop.eup %2190  ;;  %v953_v9 = vmul.f32 %v2189_v19, %v951_v62  ;;  %2192 = vrcp.f32 %v990_v56  ;;  %vm958_vm4 = vweird.f32 %v2189_v19  ;;  %vm996_vm13 = vweird.f32 %v990_v56 }
 0x328   : > { %v972_v55 = vmul.f32 %v2191_v26, %v970_v10  ;;  %2194 = vtanh.f32 %v946_v16  ;;  %vm977_vm5 = vweird.f32 %v2191_v26  ;;  %vm959_vm8 = vmor %vm957_vm6, %vm958_vm4 }
 0x329   : > { %v954_v28 = vsub.f32 1.0, %v953_v9  ;;  %vm978_vm9 = vmor %vm976_vm7, %vm977_vm5 }
 0x32a   : > { %v973_v29 = vsub.f32 1.0, %v972_v55 }
 0x32b   : > { %v955_v32 = vmul.f32 %v2189_v19, %v954_v28  ;;  %v1002_v28 = vand.u32 2147483648, %v990_v56 }
 0x32c   : > { %v974_v33 = vmul.f32 %v2191_v26, %v973_v29 }
 0x32d   : > { %v2193_v40 = vpop.eup %2192  ;;  %v956_v45 = vadd.f32 %v2189_v19, %v955_v32  ;;  %v1003_v25 = vor.u32 1.1754944e-38, %v1002_v28 }
 0x32e   : > { %v975_v46 = vadd.f32 %v2191_v26, %v974_v33  ;;  %v992_v50 = vmul.f32 %v2193_v40, %v990_v56  ;;  %v2195_v13 = vpop.eup %2194  ;;  %vm997_vm12 = vweird.f32 %v2193_v40 }
 0x32f   : > { %v960_v0 = vsel %vm959_vm8, %v2189_v19, %v956_v45  ;;  %v1000_v19 = vand.u32 2147483647, %v990_v56  ;;  %vm998_vm14 = vmor %vm996_vm13, %vm997_vm12  ;;  %v1968_v56 = vld [vmem:[%s2480_s28 + $0x80] sm:$0xff] }
 0x330   : > { %v965_v21 = vsel %vm962_vm10, %v964_v42, %v960_v0  ;;  %v979_v4 = vsel %vm978_vm9, %v2191_v26, %v975_v46  ;;  %v993_v1 = vsub.f32 1.0, %v992_v50  ;;  %v1971_v50 = vld [vmem:[%s2480_s28 + $0x98] sm:$0xff] }
 0x331   : > { %v984_v60 = vsel %vm981_vm11, %v983_v7, %v979_v4  ;;  %v1007_v16 = vmul.f32 %v2195_v13, %v965_v21  ;;  %vm1001_vm15 = vcmp.eq.f32.partialorder %v1000_v19, 8.507059e+37  ;;  %v1970_v19 = vld [vmem:[%s2480_s28 + $0x90] sm:$0xff] }
 0x332   : > { %v1006_v9 = vmul.f32 %v984_v60, %v2941_v47  ;;  %v994_v55 = vmul.f32 %v2193_v40, %v993_v1 }
 0x334   : > { %v2985_v62 = vadd.f32 %v1007_v16, %v1006_v9  ;;  %v995_v10 = vadd.f32 %v2193_v40, %v994_v55 }
 0x336   : > { %2196 = vtanh.f32 %v2985_v62  ;;  %v999_v29 = vsel %vm998_vm14, %v2193_v40, %v995_v10 }
 0x337   : > { %v1004_v31 = vsel %vm1001_vm15, %v1003_v25, %v999_v29 }
 0x33c   : > { %v2197_v26 = vpop.eup %2196 }
 0x33d   : > { %v2988_v32 = vmul.f32 %v2197_v26, %v1004_v31 }
 0x33f   : > { %v1022_v47 = vpack.c.bf16 %v2988_v32, %v2988_v32 }
 0x341   : > { %1031 = vmatmul.bf16.vlgmr.msra.gmra.mxu0 %v1022_v47  ;;  %1044 = vmatmul.bf16.vlgmr.msrb.gmra.mxu1 %v1022_v47 }
 0x342   : > { %1057 = vmatmul.bf16.vlgmr.msrb.gmra.mxu2 %v1022_v47  ;;  %1070 = vmatmul.bf16.vlgmr.msra.gmra.mxu3 %v1022_v47 }
 0x343   : > { %1285 = vmatpush.bf16.msra.mxu0 %v2494_v36  ;;  %1298 = vmatpush.bf16.msrb.mxu1 %v2696_v41 }
 0x344   : > { %1311 = vmatpush.bf16.msrb.mxu2 %v2515_v43  ;;  %1324 = vmatpush.bf16.msra.mxu3 %v2532_v49 }
 0x347   : > { %1286 = vmatpush.bf16.msra.mxu0 %v2503_v39  ;;  %1299 = vmatpush.bf16.msrb.mxu1 %v2719_v53 }
 0x348   : > { %1312 = vmatpush.bf16.msrb.mxu2 %v2530_v48  ;;  %1325 = vmatpush.bf16.msra.mxu3 %v2557_v57 }
 0x34b   : > { %1287 = vmatpush.bf16.msra.mxu0 %v2538_v51  ;;  %1300 = vmatpush.bf16.msrb.mxu1 %v2734_v59 }
 0x34c   : > { %1313 = vmatpush.bf16.msrb.mxu2 %v2560_v58  ;;  %1326 = vmatpush.bf16.msra.mxu3 %v2585_v2 }
 0x34f   : > { %1288 = vmatpush.bf16.msra.mxu0 %v2569_v61  ;;  %1301 = vmatpush.bf16.msrb.mxu1 %v2747_v63 }
 0x350   : > { %1314 = vmatpush.bf16.msrb.mxu2 %v2594_v5  ;;  %1327 = vmatpush.bf16.msra.mxu3 %v2613_v11 }
 0x353   : > { %1289 = vmatpush.bf16.msra.mxu0 %v2597_v6  ;;  %1302 = vmatpush.bf16.msrb.mxu1 %v2759_v3 }
 0x354   : > { %1315 = vmatpush.bf16.msrb.mxu2 %v2622_v14  ;;  %1328 = vmatpush.bf16.msra.mxu3 %v2641_v20 }
 0x357   : > { %1290 = vmatpush.bf16.msra.mxu0 %v2625_v15  ;;  %1303 = vmatpush.bf16.msrb.mxu1 %v2771_v8 }
 0x358   : > { %1316 = vmatpush.bf16.msrb.mxu2 %v2650_v23  ;;  %1329 = vmatpush.bf16.msra.mxu3 %v2672_v30 }
 0x35b   : > { %1291 = vmatpush.bf16.msra.mxu0 %v2653_v24  ;;  %1304 = vmatpush.bf16.msrb.mxu1 %v2783_v12 }
 0x35c   : > { %1317 = vmatpush.bf16.msrb.mxu2 %v2684_v34  ;;  %1330 = vmatpush.bf16.msra.mxu3 %v2702_v44 }
 0x35f   : > { %1292 = vmatpush.bf16.msra.mxu0 %v2687_v35  ;;  %1305 = vmatpush.bf16.msrb.mxu1 %v2795_v17 }
 0x360   : > { %1318 = vmatpush.bf16.msrb.mxu2 %v2714_v52  ;;  %1331 = vmatpush.bf16.msra.mxu3 %v2722_v54 }
 0x3be   : > { %v1032_v33 = vpop.f32.mrf.mxu0  ;;  %v1045_v38 = vpop.f32.mrf.mxu1 }
 0x3bf   : > { %v1075_v40 = vadd.f32 %v1968_v56, %v1032_v33  ;;  %v1076_v45 = vadd.f32 %v1969_v37, %v1045_v38 }
 0x3c1   : > { %v1972_v42 = vmul.f32 -1.442695, %v1075_v40  ;;  %v1973_v46 = vmul.f32 -1.442695, %v1076_v45 }
 0x3c3   : > { %2198 = vpow2.f32 %v1972_v42 }
 0x3c4   : > { %2200 = vpow2.f32 %v1973_v46 }
 0x3c5   : > { %v1058_v7 = vpop.f32.mrf.mxu2  ;;  %v1071_v0 = vpop.f32.mrf.mxu3 }
 0x3c6   : > { %v1078_v13 = vadd.f32 %v1971_v50, %v1071_v0  ;;  %v1034_v21 = vpop.f32.mrf.mxu0  ;;  %v1047_v4 = vpop.f32.mrf.mxu1  ;;  %v1077_v31 = vadd.f32 %v1970_v19, %v1058_v7 }
 0x3c8   : > { %v1974_v1 = vmul.f32 -1.442695, %v1078_v13 }
 0x3c9   : > { %v2199_v60 = vpop.eup %2198 }
 0x3ca   : > { %v2201_v16 = vpop.eup %2200  ;;  %v1082_v9 = vadd.f32 1.0, %v2199_v60  ;;  %2202 = vpow2.f32 %v1974_v1 }
 0x3cb   : > { %v1101_v55 = vadd.f32 1.0, %v2201_v16 }
 0x3cc   : > { %2204 = vrcp.f32 %v1082_v9  ;;  %v1094_v40 = vand.u32 2147483648, %v1082_v9  ;;  %v1092_v46 = vand.u32 2147483647, %v1082_v9  ;;  %vm1088_vm2 = vweird.f32 %v1082_v9 }
 0x3cd   : > { %2206 = vrcp.f32 %v1101_v55  ;;  %v1060_v10 = vpop.f32.mrf.mxu2  ;;  %v1073_v28 = vpop.f32.mrf.mxu3  ;;  %v1113_v45 = vand.u32 2147483648, %v1101_v55  ;;  %v1111_v0 = vand.u32 2147483647, %v1101_v55  ;;  %vm1107_vm3 = vweird.f32 %v1101_v55 }
 0x3ce   : > { %v1095_v7 = vor.u32 1.1754944e-38, %v1094_v40  ;;  %vm1093_vm6 = vcmp.eq.f32.partialorder %v1092_v46, 8.507059e+37 }
 0x3cf   : > { %v1114_v60 = vor.u32 1.1754944e-38, %v1113_v45  ;;  %vm1112_vm7 = vcmp.eq.f32.partialorder %v1111_v0, 8.507059e+37 }
 0x3d0   : > { %v2203_v29 = vpop.eup %2202 }
 0x3d1   : > { %v1121_v25 = vadd.f32 1.0, %v2203_v29 }
 0x3d2   : > { %v2205_v26 = vpop.eup %2204 }
 0x3d3   : > { %v2207_v47 = vpop.eup %2206  ;;  %v1084_v56 = vmul.f32 %v2205_v26, %v1082_v9  ;;  %2208 = vrcp.f32 %v1121_v25  ;;  %vm1089_vm0 = vweird.f32 %v2205_v26  ;;  %vm1127_vm9 = vweird.f32 %v1121_v25 }
 0x3d4   : > { %v1103_v37 = vmul.f32 %v2207_v47, %v1101_v55  ;;  %2210 = vtanh.f32 %v1077_v31  ;;  %vm1108_vm1 = vweird.f32 %v2207_v47  ;;  %vm1090_vm4 = vmor %vm1088_vm2, %vm1089_vm0 }
 0x3d5   : > { %v1085_v33 = vsub.f32 1.0, %v1084_v56  ;;  %vm1109_vm5 = vmor %vm1107_vm3, %vm1108_vm1 }
 0x3d6   : > { %v1104_v38 = vsub.f32 1.0, %v1103_v37 }
 0x3d7   : > { %v1086_v42 = vmul.f32 %v2205_v26, %v1085_v33 }
 0x3d8   : > { %v1105_v50 = vmul.f32 %v2207_v47, %v1104_v38  ;;  %v1133_v38 = vand.u32 2147483648, %v1121_v25 }
 0x3d9   : > { %v2209_v13 = vpop.eup %2208  ;;  %v1087_v21 = vadd.f32 %v2205_v26, %v1086_v42 }
 0x3da   : > { %v1106_v4 = vadd.f32 %v2207_v47, %v1105_v50  ;;  %v1123_v1 = vmul.f32 %v2209_v13, %v1121_v25  ;;  %v2211_v10 = vpop.eup %2210  ;;  %vm1128_vm8 = vweird.f32 %v2209_v13  ;;  %v1134_v45 = vor.u32 1.1754944e-38, %v1133_v38 }
 0x3db   : > { %v1091_v16 = vsel %vm1090_vm4, %v2205_v26, %v1087_v21  ;;  %v1131_v26 = vand.u32 2147483647, %v1121_v25  ;;  %vm1129_vm10 = vmor %vm1127_vm9, %vm1128_vm8 }
 0x3dc   : > { %v1096_v28 = vsel %vm1093_vm6, %v1095_v7, %v1091_v16  ;;  %v1110_v19 = vsel %vm1109_vm5, %v2207_v47, %v1106_v4  ;;  %v1124_v29 = vsub.f32 1.0, %v1123_v1 }
 0x3dd   : > { %v1115_v31 = vsel %vm1112_vm7, %v1114_v60, %v1110_v19  ;;  %v1138_v56 = vmul.f32 %v2211_v10, %v1096_v28  ;;  %vm1132_vm11 = vcmp.eq.f32.partialorder %v1131_v26, 8.507059e+37 }
 0x3de   : > { %v1137_v37 = vmul.f32 %v1115_v31, %v2985_v62  ;;  %v1125_v33 = vmul.f32 %v2209_v13, %v1124_v29 }
 0x3e0   : > { %v3029_v9 = vadd.f32 %v1138_v56, %v1137_v37  ;;  %v1126_v55 = vadd.f32 %v2209_v13, %v1125_v33 }
 0x3e2   : > { %2212 = vtanh.f32 %v3029_v9  ;;  %v1130_v40 = vsel %vm1129_vm10, %v2209_v13, %v1126_v55 }
 0x3e3   : > { %v1135_v42 = vsel %vm1132_vm11, %v1134_v45, %v1130_v40 }
 0x3e8   : > { %v2213_v47 = vpop.eup %2212 }
 0x3e9   : > { %v3032_v46 = vmul.f32 %v2213_v47, %v1135_v42 }
 0x3eb   : > { %v1153_v62 = vpack.c.bf16 %v3032_v46, %v3032_v46 }
 0x3ed   : > { %1162 = vmatmul.bf16.vlgmr.msrb.gmra.mxu0 %v1153_v62  ;;  %1175 = vmatmul.bf16.vlgmr.msra.gmra.mxu1 %v1153_v62 }
 0x3ee   : > { %1188 = vmatmul.bf16.vlgmr.msra.gmra.mxu2 %v1153_v62  ;;  %1201 = vmatmul.bf16.vlgmr.msrb.gmra.mxu3 %v1153_v62 }
 0x3ef   : > { %1416 = vmatpush.bf16.msrb.mxu0 %v2494_v36  ;;  %1429 = vmatpush.bf16.msra.mxu1 %v2696_v41  ;;  %v1975_v36 = vld [vmem:[%s2480_s28 + $0xa0] sm:$0xff]  ;;  %v1977_v41 = vld [vmem:[%s2480_s28 + $0xb0] sm:$0xff] }
 0x3f0   : > { %1442 = vmatpush.bf16.msra.mxu2 %v2515_v43  ;;  %1455 = vmatpush.bf16.msrb.mxu3 %v2532_v49 }
 0x3f3   : > { %1417 = vmatpush.bf16.msrb.mxu0 %v2503_v39  ;;  %1430 = vmatpush.bf16.msra.mxu1 %v2719_v53  ;;  %v1976_v39 = vld [vmem:[%s2480_s28 + $0xa8] sm:$0xff] }
 0x3f4   : > { %1443 = vmatpush.bf16.msra.mxu2 %v2530_v48  ;;  %1456 = vmatpush.bf16.msrb.mxu3 %v2557_v57 }
 0x3f7   : > { %1418 = vmatpush.bf16.msrb.mxu0 %v2538_v51  ;;  %1431 = vmatpush.bf16.msra.mxu1 %v2734_v59 }
 0x3f8   : > { %1444 = vmatpush.bf16.msra.mxu2 %v2560_v58  ;;  %1457 = vmatpush.bf16.msrb.mxu3 %v2585_v2 }
 0x3fb   : > { %1419 = vmatpush.bf16.msrb.mxu0 %v2569_v61  ;;  %1432 = vmatpush.bf16.msra.mxu1 %v2747_v63  ;;  %v1978_v61 = vld [vmem:[%s2480_s28 + $0xb8] sm:$0xff] }
 0x3fc   : > { %1445 = vmatpush.bf16.msra.mxu2 %v2594_v5  ;;  %1458 = vmatpush.bf16.msrb.mxu3 %v2613_v11 }
 0x3ff   : > { %1420 = vmatpush.bf16.msrb.mxu0 %v2597_v6  ;;  %1433 = vmatpush.bf16.msra.mxu1 %v2759_v3 }
 0x400   : > { %1446 = vmatpush.bf16.msra.mxu2 %v2622_v14  ;;  %1459 = vmatpush.bf16.msrb.mxu3 %v2641_v20 }
 0x403   : > { %1421 = vmatpush.bf16.msrb.mxu0 %v2625_v15  ;;  %1434 = vmatpush.bf16.msra.mxu1 %v2771_v8 }
 0x404   : > { %1447 = vmatpush.bf16.msra.mxu2 %v2650_v23  ;;  %1460 = vmatpush.bf16.msrb.mxu3 %v2672_v30 }
 0x407   : > { %1422 = vmatpush.bf16.msrb.mxu0 %v2653_v24  ;;  %1435 = vmatpush.bf16.msra.mxu1 %v2783_v12 }
 0x408   : > { %1448 = vmatpush.bf16.msra.mxu2 %v2684_v34  ;;  %1461 = vmatpush.bf16.msrb.mxu3 %v2702_v44 }
 0x40b   : > { %1423 = vmatpush.bf16.msrb.mxu0 %v2687_v35  ;;  %1436 = vmatpush.bf16.msra.mxu1 %v2795_v17 }
 0x40c   : > { %1449 = vmatpush.bf16.msra.mxu2 %v2714_v52  ;;  %1462 = vmatpush.bf16.msrb.mxu3 %v2722_v54 }
 0x46a   : > { %v1163_v43 = vpop.f32.mrf.mxu0  ;;  %v1176_v48 = vpop.f32.mrf.mxu1 }
 0x46b   : > { %v1206_v49 = vadd.f32 %v1975_v36, %v1163_v43  ;;  %v1207_v51 = vadd.f32 %v1976_v39, %v1176_v48  ;;  %v1982_v48 = vld [vmem:[%s2480_s28 + $0xc0] sm:$0xff] }
 0x46d   : > { %v1979_v57 = vmul.f32 -1.442695, %v1206_v49  ;;  %v1980_v58 = vmul.f32 -1.442695, %v1207_v51  ;;  %v1983_v49 = vld [vmem:[%s2480_s28 + $0xc8] sm:$0xff] }
 0x46e   : > { %v2074_v51 = vld [vmem:[%s3195_s2 + $0x38] sm:$0xff] }
 0x46f   : > { %2214 = vpow2.f32 %v1979_v57 }
 0x470   : > { %2216 = vpow2.f32 %v1980_v58 }
 0x471   : > { %v1189_v2 = vpop.f32.mrf.mxu2  ;;  %v1202_v5 = vpop.f32.mrf.mxu3 }
 0x472   : > { %v1209_v6 = vadd.f32 %v1978_v61, %v1202_v5  ;;  %v1165_v11 = vpop.f32.mrf.mxu0  ;;  %v1178_v14 = vpop.f32.mrf.mxu1  ;;  %v1208_v54 = vadd.f32 %v1977_v41, %v1189_v2 }
 0x473   : > { %v2073_v11 = vld [vmem:[%s3195_s2 + $0x30] sm:$0xff]  ;;  %v1985_v14 = vld [vmem:[%s2480_s28 + $0xd8] sm:$0xff] }
 0x474   : > { %v1981_v15 = vmul.f32 -1.442695, %v1209_v6 }
 0x475   : > { %v2215_v20 = vpop.eup %2214 }
 0x476   : > { %v2217_v23 = vpop.eup %2216  ;;  %v1213_v24 = vadd.f32 1.0, %v2215_v20  ;;  %2218 = vpow2.f32 %v1981_v15 }
 0x477   : > { %v1232_v30 = vadd.f32 1.0, %v2217_v23  ;;  %v2072_v23 = vld [vmem:[%s3195_s2 + $0x28] sm:$0xff] }
 0x478   : > { %2220 = vrcp.f32 %v1213_v24  ;;  %v1225_v17 = vand.u32 2147483648, %v1213_v24  ;;  %v1223_v0 = vand.u32 2147483647, %v1213_v24  ;;  %vm1219_vm14 = vweird.f32 %v1213_v24 }
 0x479   : > { %2222 = vrcp.f32 %v1232_v30  ;;  %v1191_v34 = vpop.f32.mrf.mxu2  ;;  %v1204_v35 = vpop.f32.mrf.mxu3  ;;  %v1244_v25 = vand.u32 2147483648, %v1232_v30  ;;  %v1242_v21 = vand.u32 2147483647, %v1232_v30  ;;  %vm1238_vm15 = vweird.f32 %v1232_v30 }
 0x47a   : > { %v1226_v1 = vor.u32 1.1754944e-38, %v1225_v17  ;;  %vm1224_vm2 = vcmp.eq.f32.partialorder %v1223_v0, 8.507059e+37 }
 0x47b   : > { %v1245_v10 = vor.u32 1.1754944e-38, %v1244_v25  ;;  %vm1243_vm3 = vcmp.eq.f32.partialorder %v1242_v21, 8.507059e+37 }
 0x47c   : > { %v2219_v44 = vpop.eup %2218 }
 0x47d   : > { %v1252_v52 = vadd.f32 1.0, %v2219_v44  ;;  %v2071_v44 = vld [vmem:[%s3195_s2 + $0x20] sm:$0xff] }
 0x47e   : > { %v2221_v53 = vpop.eup %2220 }
 0x47f   : > { %v2223_v59 = vpop.eup %2222  ;;  %v1215_v63 = vmul.f32 %v2221_v53, %v1213_v24  ;;  %2224 = vrcp.f32 %v1252_v52  ;;  %vm1220_vm12 = vweird.f32 %v2221_v53  ;;  %v1264_v45 = vand.u32 2147483648, %v1252_v52 }
 0x480   : > { %v1234_v3 = vmul.f32 %v2223_v59, %v1232_v30  ;;  %2226 = vtanh.f32 %v1208_v54  ;;  %vm1239_vm13 = vweird.f32 %v2223_v59  ;;  %vm1221_vm0 = vmor %vm1219_vm14, %vm1220_vm12  ;;  %vm1258_vm5 = vweird.f32 %v1252_v52 }
 0x481   : > { %v1216_v8 = vsub.f32 1.0, %v1215_v63  ;;  %vm1240_vm1 = vmor %vm1238_vm15, %vm1239_vm13  ;;  %v1262_v47 = vand.u32 2147483647, %v1252_v52  ;;  %v1265_v62 = vor.u32 1.1754944e-38, %v1264_v45 }
 0x482   : > { %v1235_v12 = vsub.f32 1.0, %v1234_v3  ;;  %v2070_v3 = vld [vmem:[%s3195_s2 + $0x18] sm:$0xff] }
 0x483   : > { %v1217_v50 = vmul.f32 %v2221_v53, %v1216_v8  ;;  %vm1263_vm7 = vcmp.eq.f32.partialorder %v1262_v47, 8.507059e+37  ;;  %v1984_v8 = vld [vmem:[%s2480_s28 + $0xd0] sm:$0xff] }
 0x484   : > { %v1236_v13 = vmul.f32 %v2223_v59, %v1235_v12  ;;  %v2069_v12 = vld [vmem:[%s3195_s2 + $0x10] sm:$0xff] }
 0x485   : > { %v2225_v7 = vpop.eup %2224  ;;  %v1218_v4 = vadd.f32 %v2221_v53, %v1217_v50 }
 0x486   : > { %v1237_v60 = vadd.f32 %v2223_v59, %v1236_v13  ;;  %v1254_v16 = vmul.f32 %v2225_v7, %v1252_v52  ;;  %v2227_v19 = vpop.eup %2226  ;;  %vm1259_vm4 = vweird.f32 %v2225_v7 }
 0x487   : > { %v1222_v28 = vsel %vm1221_vm0, %v2221_v53, %v1218_v4  ;;  %vm1260_vm6 = vmor %vm1258_vm5, %vm1259_vm4  ;;  %vm1648_vm4 = vcmask 261120  }
 0x488   : > { %v1227_v29 = vsel %vm1224_vm2, %v1226_v1, %v1222_v28  ;;  %v1241_v31 = vsel %vm1240_vm1, %v2223_v59, %v1237_v60  ;;  %v1255_v56 = vsub.f32 1.0, %v1254_v16 }
 0x489   : > { %v1246_v37 = vsel %vm1243_vm3, %v1245_v10, %v1241_v31  ;;  %v1269_v33 = vmul.f32 %v2227_v19, %v1227_v29  ;;  %v2067_v29 = vld [vmem:[%s3195_s2] sm:$0xff] }
 0x48a   : > { %v1268_v55 = vmul.f32 %v1246_v37, %v3029_v9  ;;  %v1256_v38 = vmul.f32 %v2225_v7, %v1255_v56 }
 0x48c   : > { %v3073_v26 = vadd.f32 %v1269_v33, %v1268_v55  ;;  %v1257_v40 = vadd.f32 %v2225_v7, %v1256_v38 }
 0x48e   : > { %2228 = vtanh.f32 %v3073_v26  ;;  %v1261_v42 = vsel %vm1260_vm6, %v2225_v7, %v1257_v40  ;;  %v2068_v7 = vld [vmem:[%s3195_s2 + $0x8] sm:$0xff] }
 0x48f   : > { %v1266_v39 = vsel %vm1263_vm7, %v1265_v62, %v1261_v42 }
 0x494   : > { %v2229_v36 = vpop.eup %2228 }
 0x495   : > { %v3076_v43 = vmul.f32 %v2229_v36, %v1266_v39 }
 0x497   : > { %v1284_v9 = vpack.c.bf16 %v3076_v43, %v3076_v43 }
 0x499   : > { %1293 = vmatmul.bf16.vlgmr.msra.gmra.mxu0 %v1284_v9  ;;  %1306 = vmatmul.bf16.vlgmr.msrb.gmra.mxu1 %v1284_v9 }
 0x49a   : > { %1319 = vmatmul.bf16.vlgmr.msrb.gmra.mxu2 %v1284_v9  ;;  %1332 = vmatmul.bf16.vlgmr.msra.gmra.mxu3 %v1284_v9 }
 0x49b   : > { %1619 = vmatpush.bf16.msra.mxu0 %v2074_v51 }
 0x49f   : > { %1620 = vmatpush.bf16.msra.mxu0 %v2073_v11 }
 0x4a3   : > { %1621 = vmatpush.bf16.msra.mxu0 %v2072_v23  ;;  %v1548_v23 = vpack.c.bf16 %v2988_v32, %v2944_v27 }
 0x4a7   : > { %1622 = vmatpush.bf16.msra.mxu0 %v2071_v44 }
 0x4ab   : > { %1623 = vmatpush.bf16.msra.mxu0 %v2070_v3 }
 0x4af   : > { %1624 = vmatpush.bf16.msra.mxu0 %v2069_v12 }
 0x4b3   : > { %1625 = vmatpush.bf16.msra.mxu0 %v2068_v7 }
 0x4b7   : > { %1626 = vmatpush.bf16.msra.mxu0 %v2067_v29 }
 0x516   : > { %v1294_v57 = vpop.f32.mrf.mxu0  ;;  %v1307_v58 = vpop.f32.mrf.mxu1 }
 0x517   : > { %v1337_v61 = vadd.f32 %v1982_v48, %v1294_v57  ;;  %v1338_v2 = vadd.f32 %v1983_v49, %v1307_v58 }
 0x519   : > { %v1986_v5 = vmul.f32 -1.442695, %v1337_v61  ;;  %v1987_v6 = vmul.f32 -1.442695, %v1338_v2 }
 0x51b   : > { %2230 = vpow2.f32 %v1986_v5 }
 0x51c   : > { %2232 = vpow2.f32 %v1987_v6 }
 0x51d   : > { %v1320_v15 = vpop.f32.mrf.mxu2  ;;  %v1333_v20 = vpop.f32.mrf.mxu3 }
 0x51e   : > { %v1340_v24 = vadd.f32 %v1985_v14, %v1333_v20  ;;  %v1296_v30 = vpop.f32.mrf.mxu0  ;;  %v1309_v34 = vpop.f32.mrf.mxu1  ;;  %v1339_v0 = vadd.f32 %v1984_v8, %v1320_v15  ;;  %v1547_v20 = vpack.c.bf16 %v2900_v22, %v2850_v18 }
 0x51f   : > { %v1989_v30 = vld [vmem:[%s2480_s28 + $0xe0] sm:$0xff]  ;;  %v1990_v34 = vld [vmem:[%s2480_s28 + $0xe8] sm:$0xff] }
 0x520   : > { %v1988_v35 = vmul.f32 -1.442695, %v1340_v24  ;;  %v1549_v24 = vpack.c.bf16 %v3076_v43, %v3032_v46 }
 0x521   : > { %v2231_v41 = vpop.eup %2230 }
 0x522   : > { %v2233_v52 = vpop.eup %2232  ;;  %v1344_v53 = vadd.f32 1.0, %v2231_v41  ;;  %2234 = vpow2.f32 %v1988_v35 }
 0x523   : > { %v1363_v54 = vadd.f32 1.0, %v2233_v52 }
 0x524   : > { %2236 = vrcp.f32 %v1344_v53  ;;  %v1356_v16 = vand.u32 2147483648, %v1344_v53  ;;  %v1354_v19 = vand.u32 2147483647, %v1344_v53  ;;  %vm1350_vm10 = vweird.f32 %v1344_v53 }
 0x525   : > { %2238 = vrcp.f32 %v1363_v54  ;;  %v1322_v59 = vpop.f32.mrf.mxu2  ;;  %v1335_v63 = vpop.f32.mrf.mxu3  ;;  %v1375_v10 = vand.u32 2147483648, %v1363_v54  ;;  %v1373_v56 = vand.u32 2147483647, %v1363_v54  ;;  %vm1369_vm11 = vweird.f32 %v1363_v54 }
 0x526   : > { %v1357_v55 = vor.u32 1.1754944e-38, %v1356_v16  ;;  %vm1355_vm14 = vcmp.eq.f32.partialorder %v1354_v19, 8.507059e+37  ;;  %v1992_v59 = vld [vmem:[%s2480_s28 + $0xf8] sm:$0xff] }
 0x527   : > { %v1376_v45 = vor.u32 1.1754944e-38, %v1375_v10  ;;  %vm1374_vm15 = vcmp.eq.f32.partialorder %v1373_v56, 8.507059e+37 }
 0x528   : > { %v2235_v17 = vpop.eup %2234 }
 0x529   : > { %v1383_v25 = vadd.f32 1.0, %v2235_v17  ;;  %v3128_v17 = vld [vmem:[%s3196_s3] ss:$0 sm:$0xff] }
 0x52a   : > { %v2237_v50 = vpop.eup %2236 }
 0x52b   : > { %v2239_v13 = vpop.eup %2238  ;;  %v1346_v21 = vmul.f32 %v2237_v50, %v1344_v53  ;;  %2240 = vrcp.f32 %v1383_v25  ;;  %vm1351_vm8 = vweird.f32 %v2237_v50  ;;  %v1395_v61 = vand.u32 2147483648, %v1383_v25 }
 0x52c   : > { %v1365_v4 = vmul.f32 %v2239_v13, %v1363_v54  ;;  %2242 = vtanh.f32 %v1339_v0  ;;  %vm1370_vm9 = vweird.f32 %v2239_v13  ;;  %vm1352_vm12 = vmor %vm1350_vm10, %vm1351_vm8  ;;  %vm1389_vm1 = vweird.f32 %v1383_v25 }
 0x52d   : > { %v1347_v1 = vsub.f32 1.0, %v1346_v21  ;;  %vm1371_vm13 = vmor %vm1369_vm11, %vm1370_vm9  ;;  %v1393_v2 = vand.u32 2147483647, %v1383_v25  ;;  %v1396_v6 = vor.u32 1.1754944e-38, %v1395_v61 }
 0x52e   : > { %v1366_v60 = vsub.f32 1.0, %v1365_v4 }
 0x52f   : > { %v1348_v28 = vmul.f32 %v2237_v50, %v1347_v1  ;;  %vm1394_vm3 = vcmp.eq.f32.partialorder %v1393_v2, 8.507059e+37 }
 0x530   : > { %v1367_v31 = vmul.f32 %v2239_v13, %v1366_v60 }
 0x531   : > { %v2241_v37 = vpop.eup %2240  ;;  %v1349_v33 = vadd.f32 %v2237_v50, %v1348_v28 }
 0x532   : > { %v1368_v38 = vadd.f32 %v2239_v13, %v1367_v31  ;;  %v1385_v40 = vmul.f32 %v2241_v37, %v1383_v25  ;;  %v2243_v42 = vpop.eup %2242  ;;  %vm1390_vm0 = vweird.f32 %v2241_v37 }
 0x533   : > { %v1353_v47 = vsel %vm1352_vm12, %v2237_v50, %v1349_v33  ;;  %vm1391_vm2 = vmor %vm1389_vm1, %vm1390_vm0 }
 0x534   : > { %v1358_v62 = vsel %vm1355_vm14, %v1357_v55, %v1353_v47  ;;  %v1372_v36 = vsel %vm1371_vm13, %v2239_v13, %v1368_v38  ;;  %v1386_v39 = vsub.f32 1.0, %v1385_v40  ;;  %v1991_v13 = vld [vmem:[%s2480_s28 + $0xf0] sm:$0xff]  ;;  %s2075_s28 = sshll.u32 (%p2392_p6), %s2300_s17, 4 }
 0x535   : > { %v1377_v9 = vsel %vm1374_vm15, %v1376_v45, %v1372_v36  ;;  %v1400_v48 = vmul.f32 %v2243_v42, %v1358_v62  ;;  %s1666_s10 = sadd.s32 (%p2392_p6), %s2304_s18, %s2075_s28 }
 0x536   : > { %v1399_v49 = vmul.f32 %v1377_v9, %v3073_v26  ;;  %v1387_v51 = vmul.f32 %v2241_v37, %v1386_v39  ;;  %s2031_s11 = sshll.u32 (%p2392_p6), %s1666_s10, 3 }
 0x537   : > { %s1668_s26 = scalar_lea.vmem (%p2392_p6), %s3197_s4, %s2031_s11 }
 0x538   : > { %v3109_v57 = vadd.f32 %v1400_v48, %v1399_v49  ;;  %v1388_v58 = vadd.f32 %v2241_v37, %v1387_v51 }
 0x53a   : > { %2244 = vtanh.f32 %v3109_v57  ;;  %v1392_v5 = vsel %vm1391_vm2, %v2241_v37, %v1388_v58 }
 0x53b   : > { %v1397_v14 = vsel %vm1394_vm3, %v1396_v6, %v1392_v5 }
 0x540   : > { %v2245_v11 = vpop.eup %2244 }
 0x541   : > { %v3112_v15 = vmul.f32 %v2245_v11, %v1397_v14 }
 0x543   : > { %v1415_v26 = vpack.c.bf16 %v3112_v15, %v3112_v15 }
 0x545   : > { %1424 = vmatmul.bf16.vlgmr.msrb.gmra.mxu0 %v1415_v26  ;;  %1437 = vmatmul.bf16.vlgmr.msra.gmra.mxu1 %v1415_v26 }
 0x546   : > { %1450 = vmatmul.bf16.vlgmr.msra.gmra.mxu2 %v1415_v26  ;;  %1463 = vmatmul.bf16.vlgmr.msrb.gmra.mxu3 %v1415_v26 }
 0x555   : > { %1627 = vmatmul.bf16.vlgmr.msra.gmra.mxu0 %v1547_v20 }
 0x565   : > { %1632 = vmatmul.bf16.gmra.mxu0 %v1548_v23 }
 0x575   : > { %1637 = vmatmul.bf16.gmra.mxu0 %v1549_v24 }
 0x5c2   : > { %v1425_v35 = vpop.f32.mrf.mxu0  ;;  %v1438_v41 = vpop.f32.mrf.mxu1 }
 0x5c3   : > { %v1468_v44 = vadd.f32 %v1989_v30, %v1425_v35  ;;  %v1469_v52 = vadd.f32 %v1990_v34, %v1438_v41 }
 0x5c5   : > { %v1993_v53 = vmul.f32 -1.442695, %v1468_v44  ;;  %v1994_v54 = vmul.f32 -1.442695, %v1469_v52 }
 0x5c7   : > { %2246 = vpow2.f32 %v1993_v53 }
 0x5c8   : > { %2248 = vpow2.f32 %v1994_v54 }
 0x5c9   : > { %v1451_v18 = vpop.f32.mrf.mxu2  ;;  %v1464_v22 = vpop.f32.mrf.mxu3 }
 0x5ca   : > { %v1471_v63 = vadd.f32 %v1992_v59, %v1464_v22  ;;  %v1427_v27 = vpop.f32.mrf.mxu0  ;;  %v1440_v32 = vpop.f32.mrf.mxu1  ;;  %v1470_v60 = vadd.f32 %v1991_v13, %v1451_v18 }
 0x5cc   : > { %v1995_v3 = vmul.f32 -1.442695, %v1471_v63 }
 0x5cd   : > { %v2247_v46 = vpop.eup %2246 }
 0x5ce   : > { %v2249_v43 = vpop.eup %2248  ;;  %v1475_v8 = vadd.f32 1.0, %v2247_v46  ;;  %2250 = vpow2.f32 %v1995_v3 }
 0x5cf   : > { %v1494_v12 = vadd.f32 1.0, %v2249_v43 }
 0x5d0   : > { %2252 = vrcp.f32 %v1475_v8  ;;  %v1485_v31 = vand.u32 2147483647, %v1475_v8  ;;  %v1487_v56 = vand.u32 2147483648, %v1475_v8  ;;  %vm1481_vm7 = vweird.f32 %v1475_v8 }
 0x5d1   : > { %2254 = vrcp.f32 %v1494_v12  ;;  %v1453_v25 = vpop.f32.mrf.mxu2  ;;  %v1466_v50 = vpop.f32.mrf.mxu3  ;;  %v1506_v33 = vand.u32 2147483648, %v1494_v12  ;;  %v1504_v45 = vand.u32 2147483647, %v1494_v12  ;;  %vm1500_vm8 = vweird.f32 %v1494_v12 }
 0x5d2   : > { %v1628_v0 = vpop.f32.mrf.mxu0  ;;  %v1488_v62 = vor.u32 1.1754944e-38, %v1487_v56  ;;  %vm1486_vm11 = vcmp.eq.f32.partialorder %v1485_v31, 8.507059e+37 }
 0x5d3   : > { %v1629_v21 = vadd.f32 %v3128_v17, %v1628_v0  ;;  %v1507_v9 = vor.u32 1.1754944e-38, %v1506_v33  ;;  %vm1505_vm12 = vcmp.eq.f32.partialorder %v1504_v45, 8.507059e+37 }
 0x5d4   : > { %v2251_v7 = vpop.eup %2250 }
 0x5d5   : > { %v1514_v4 = vadd.f32 1.0, %v2251_v7  ;;  %1649 = vst.msk [vmem:[%s2482_s29] sm:$0xff] %vm1648_vm4, %v1629_v21 }
 0x5d6   : > { %v2253_v1 = vpop.eup %2252 }
 0x5d7   : > { %v2255_v16 = vpop.eup %2254  ;;  %v1477_v10 = vmul.f32 %v2253_v1, %v1475_v8  ;;  %2256 = vrcp.f32 %v1514_v4  ;;  %vm1482_vm5 = vweird.f32 %v2253_v1  ;;  %v1526_v24 = vand.u32 2147483648, %v1514_v4 }
 0x5d8   : > { %v1496_v28 = vmul.f32 %v2255_v16, %v1494_v12  ;;  %2258 = vtanh.f32 %v1470_v60  ;;  %vm1501_vm6 = vweird.f32 %v2255_v16  ;;  %vm1483_vm9 = vmor %vm1481_vm7, %vm1482_vm5  ;;  %vm1520_vm14 = vweird.f32 %v1514_v4 }
 0x5d9   : > { %v1478_v19 = vsub.f32 1.0, %v1477_v10  ;;  %vm1502_vm10 = vmor %vm1500_vm8, %vm1501_vm6  ;;  %v1524_v30 = vand.u32 2147483647, %v1514_v4 }
 0x5da   : > { %v1497_v29 = vsub.f32 1.0, %v1496_v28  ;;  %v1630_v37 = vpop.f32.mrf.mxu0 }
 0x5db   : > { %v1479_v55 = vmul.f32 %v2253_v1, %v1478_v19  ;;  %v1631_v38 = vadd.f32 %v3128_v17, %v1630_v37  ;;  %vm1525_vm0 = vcmp.eq.f32.partialorder %v1524_v30, 8.507059e+37 }
 0x5dc   : > { %v1498_v40 = vmul.f32 %v2255_v16, %v1497_v29 }
 0x5dd   : > { %v2257_v47 = vpop.eup %2256  ;;  %v1480_v42 = vadd.f32 %v2253_v1, %v1479_v55  ;;  %1650 = vst.msk [vmem:[%s2482_s29 + $0x8] sm:$0xff] %vm1648_vm4, %v1631_v38 }
 0x5de   : > { %v1499_v36 = vadd.f32 %v2255_v16, %v1498_v40  ;;  %v1516_v39 = vmul.f32 %v2257_v47, %v1514_v4  ;;  %v2259_v49 = vpop.eup %2258  ;;  %vm1521_vm13 = vweird.f32 %v2257_v47 }
 0x5df   : > { %v1484_v48 = vsel %vm1483_vm9, %v2253_v1, %v1480_v42  ;;  %vm1522_vm15 = vmor %vm1520_vm14, %vm1521_vm13 }
 0x5e0   : > { %v1489_v51 = vsel %vm1486_vm11, %v1488_v62, %v1484_v48  ;;  %v1503_v58 = vsel %vm1502_vm10, %v2255_v16, %v1499_v36  ;;  %v1517_v61 = vsub.f32 1.0, %v1516_v39 }
 0x5e1   : > { %v1508_v2 = vsel %vm1505_vm12, %v1507_v9, %v1503_v58  ;;  %v1531_v5 = vmul.f32 %v2259_v49, %v1489_v51 }
 0x5e2   : > { %v1530_v6 = vmul.f32 %v1508_v2, %v3109_v57  ;;  %v1633_v11 = vpop.f32.mrf.mxu0  ;;  %v1518_v14 = vmul.f32 %v2257_v47, %v1517_v61  ;;  %v1527_v57 = vor.u32 1.1754944e-38, %v1526_v24 }
 0x5e3   : > { %v1634_v26 = vadd.f32 %v3128_v17, %v1633_v11 }
 0x5e4   : > { %v1532_v20 = vadd.f32 %v1531_v5, %v1530_v6  ;;  %v1519_v23 = vadd.f32 %v2257_v47, %v1518_v14  ;;  %v1713_v43 = vld [vmem:[%s2482_s29 + $0x8] sm:$0xff] (%p2392_p6) }
 0x5e5   : > { %1651 = vst.msk [vmem:[%s2482_s29 + $0x10] sm:$0xff] %vm1648_vm4, %v1634_v26 }
 0x5e6   : > { %1536 = vst [vmem:[#allocation3] sm:$0xff] %v1532_v20  ;;  %2260 = vtanh.f32 %v1532_v20  ;;  %v1523_v34 = vsel %vm1522_vm15, %v2257_v47, %v1519_v23 }
 0x5e7   : > { %v1528_v52 = vsel %vm1525_vm0, %v1527_v57, %v1523_v34  ;;  %1714 = vst [vmem:[%s1668_s26 + $0x10] sm:$0xff] (%p2392_p6), %v1713_v43 }
 0x5ea   : > { %v1635_v35 = vpop.f32.mrf.mxu0 }
 0x5eb   : > { %v1636_v41 = vadd.f32 %v3128_v17, %v1635_v35 }
 0x5ec   : > { %v2261_v44 = vpop.eup %2260  ;;  %v1715_v8 = vld [vmem:[%s2482_s29 + $0x10] sm:$0xff] (%p2392_p6) }
 0x5ed   : > { %1652 = vst.msk [vmem:[%s2482_s29 + $0x18] sm:$0xff] %vm1648_vm4, %v1636_v41  ;;  %v1534_v53 = vmul.f32 %v2261_v44, %v1528_v52 }
 0x5ee   : > { %1716 = vst [vmem:[%s1668_s26 + $0x20] sm:$0xff] (%p2392_p6), %v1715_v8 }
 0x5ef   : > { %1535 = vst [vmem:[#allocation2] sm:$0xff] %v1534_v53  ;;  %v1550_v54 = vpack.c.bf16 %v1534_v53, %v3112_v15  ;;  %v1711_v15 = vld [vmem:[%s2482_s29] sm:$0xff] (%p2392_p6) }
 0x5f0   : > { %1712 = vst [vmem:[%s1668_s26] sm:$0xff] (%p2392_p6), %v1711_v15 }
 0x5f1   : > { %1642 = vmatmul.bf16.gmra.mxu0 %v1550_v54 }
 0x5f2   : > { %v1638_v59 = vpop.f32.mrf.mxu0 }
 0x5f3   : > { %v1639_v18 = vadd.f32 %v3128_v17, %v1638_v59 }
 0x5f4   : > { %v1717_v12 = vld [vmem:[%s2482_s29 + $0x18] sm:$0xff] (%p2392_p6) }
 0x5f5   : > { %1653 = vst.msk [vmem:[%s2482_s29 + $0x20] sm:$0xff] %vm1648_vm4, %v1639_v18 }
 0x5f6   : > { %1718 = vst [vmem:[%s1668_s26 + $0x30] sm:$0xff] (%p2392_p6), %v1717_v12 }
 0x5fa   : > { %v1640_v22 = vpop.f32.mrf.mxu0 }
 0x5fb   : > { %v1641_v63 = vadd.f32 %v3128_v17, %v1640_v22 }
 0x5fd   : > { %1654 = vst.msk [vmem:[%s2482_s29 + $0x28] sm:$0xff] %vm1648_vm4, %v1641_v63 }
 0x604   : > { %v1721_v25 = vld [vmem:[%s2482_s29 + $0x28] sm:$0xff] (%p2392_p6) }
 0x605   : > { %1722 = vst [vmem:[%s1668_s26 + $0x50] sm:$0xff] (%p2392_p6), %v1721_v25 }
 0x66e   : > { %v1643_v27 = vpop.f32.mrf.mxu0 }
 0x66f   : > { %v1644_v32 = vadd.f32 %v3128_v17, %v1643_v27 }
 0x671   : > { %1655 = vst.msk [vmem:[%s2482_s29 + $0x30] sm:$0xff] %vm1648_vm4, %v1644_v32 }
 0x675   : > { %1663 = sbr.rel (!%p2392_p6) target bundleno = 1666 (0x682), region = 67 }
 0x676   : > { %v1645_v3 = vpop.f32.mrf.mxu0 }
 0x677   : > { %v1646_v46 = vadd.f32 %v3128_v17, %v1645_v3  ;;  %v1719_v17 = vld [vmem:[%s2482_s29 + $0x20] sm:$0xff] (%p2392_p6) }
 0x678   : > { %v1723_v50 = vld [vmem:[%s2482_s29 + $0x30] sm:$0xff] (%p2392_p6)  ;;  %1720 = vst [vmem:[%s1668_s26 + $0x40] sm:$0xff] (%p2392_p6), %v1719_v17 }
 0x679   : > { %1656 = vst.msk [vmem:[%s2482_s29 + $0x38] sm:$0xff] %vm1648_vm4, %v1646_v46 }
 0x67a   : > { %1724 = vst [vmem:[%s1668_s26 + $0x60] sm:$0xff] %v1723_v50 }
 0x680   : > { %v1725_v0 = vld [vmem:[%s2482_s29 + $0x38] sm:$0xff] }
 0x681   : > { %1726 = vst [vmem:[%s1668_s26 + $0x70] sm:$0xff] %v1725_v0 }
 0x682 PF: > { %s14_s21 = sadd.s32 1, %s2316_s21   ;;  %s3203_s15 = smov %s2296_s16 }
 0x683   : > { %p11_p13 = scmp.ge.s32.totalorder %s14_s21, 6   ;;  %s3204_s16 = smov %s2400_s30 }
 0x684   : > { %s3205_s17 = smov %s2308_s19  ;;  %s3206_s18 = smov %s2312_s20 }
 0x685   : > { %s3207_s19 = smov %s3210_s22  ;;  %s3208_s20 = smov %s3214_s23 }
 0x686   :  { %13 = sbr.rel (!%p11_p13) target bundleno = 4 (0x4), region = 150 }

</bundles_post_ra>
